<compile_context>
chip_gen: v7x
topology: tpu7x:2x2x1
jax: 0.10.0
libtpu: 0.0.40
codegen_flags: <defaults>
</compile_context>

<pallas_src>
import functools
import math

import jax
import jax.numpy as jnp
from jax import lax
from jax.experimental import pallas as pl
from jax.experimental.pallas import tpu as pltpu

EPS = 1e-12                       # espnet LayerNorm eps
NEG_INF = -3.4028235e38           # float32 min, matches torch masked_fill value


def _layer_norm(z, g, b):
    mu = jnp.mean(z, axis=-1, keepdims=True)
    var = jnp.mean((z - mu) ** 2, axis=-1, keepdims=True)
    return (z - mu) * lax.rsqrt(var + EPS) * g + b


def encoder_layer_kernel(x_ref, mask_ref,
                         g1_ref, b1_ref, g2_ref, b2_ref,
                         wqkv_ref, bqkv_ref, wo_h_ref, bo_ref,
                         w1_ref, bf1_ref, w2_ref, bf2_ref,
                         o_ref,
                         q_s, k_s, v_s,
                         *, n_heads, compute_dtype):
    f32 = jnp.float32
    cdt = compute_dtype

    x = x_ref[...]                                # (T, D) f32
    T, D = x.shape
    H = n_heads
    dk = D // H
    scale = 1.0 / math.sqrt(dk)

    keep = mask_ref[...] > 0.0                    # (1, T): broadcasts over rows

    # --- self-attention block -------------------------------------------------
    xn = _layer_norm(x, g1_ref[...], b1_ref[...])                       # f32
    # fused QKV: one MXU pass with N = 3D, bf16 inputs, f32 accumulation
    qkv = jnp.dot(xn.astype(cdt), wqkv_ref[...],
                  preferred_element_type=f32) + bqkv_ref[...]           # (T, 3D)

    # Scatter into head-major scratches (static lane offsets); fold the
    # 1/sqrt(dk) scale into q once.
    for h in range(H):
        q_s[h] = (qkv[:, h * dk:(h + 1) * dk] * scale).astype(cdt)
        k_s[h] = qkv[:, D + h * dk:D + (h + 1) * dk].astype(cdt)
        v_s[h] = qkv[:, 2 * D + h * dk:2 * D + (h + 1) * dk].astype(cdt)

    contract_last = (((1,), (1,)), ((), ()))      # q @ k^T without k.T

    def head_body(h, att):
        qh = q_s[h]                               # (T, dk) compute dtype
        kh = k_s[h]
        vh = v_s[h]
        s = lax.dot_general(qh, kh, contract_last,
                            preferred_element_type=f32)                 # (T, T)
        s = jnp.where(keep, s, NEG_INF)
        s = s - jnp.max(s, axis=-1, keepdims=True)
        p = jnp.exp(s)
        p = p * pl.reciprocal(jnp.sum(p, axis=-1, keepdims=True), approx=True)
        p = jnp.where(keep, p, 0.0)               # torch: masked_fill(attn, 0.0)
        ctx_h = jnp.dot(p.astype(cdt), vh, preferred_element_type=f32)  # (T, dk)
        # output projection folded into the head loop: att += ctx_h @ Wo[h]
        return att + jnp.dot(ctx_h.astype(cdt), wo_h_ref[h],
                             preferred_element_type=f32)

    att = lax.fori_loop(0, H, head_body, jnp.zeros((T, D), f32))
    att = att + bo_ref[...]
    x1 = x + att                                  # residual add (f32)

    # --- feed-forward block ---------------------------------------------------
    xn2 = _layer_norm(x1, g2_ref[...], b2_ref[...])
    h1 = jnp.maximum(
        jnp.dot(xn2.astype(cdt), w1_ref[...],
                preferred_element_type=f32) + bf1_ref[...], 0.0)
    ff = jnp.dot(h1.astype(cdt), w2_ref[...],
                 preferred_element_type=f32) + bf2_ref[...]

    o_ref[...] = (x1 + ff).astype(o_ref.dtype)


def encoder_layer(x, mask, params, n_heads, compute_dtype=jnp.bfloat16):
    B, T, D = x.shape
    assert D % n_heads == 0
    dk = D // n_heads
    Dff = params["w1"].shape[1]
    f32 = jnp.float32
    cdt = compute_dtype

    # Boundary prep (plain XLA, cheap): fuse QKV weights, head-group the output
    # projection, cast matmul weights to the MXU compute dtype. Biases and LN
    # parameters stay f32 (added after f32 accumulation).
    wqkv = jnp.concatenate([params["wq"], params["wk"], params["wv"]],
                           axis=1).astype(cdt)                     # (D, 3D)
    bqkv = jnp.concatenate([params["bq"], params["bk"], params["bv"]],
                           axis=1).astype(f32)                     # (1, 3D)
    wo_h = params["wo"].reshape(n_heads, dk, D).astype(cdt)        # (H, dk, D)
    w1c = params["w1"].astype(cdt)
    w2c = params["w2"].astype(cdt)

    x = x.astype(f32)
    mask = mask.astype(f32)

    def full(shape):
        nd = len(shape)
        return pl.BlockSpec(shape, lambda b: (0,) * nd)

    in_specs = [
        pl.BlockSpec((None, T, D), lambda b: (b, 0, 0)),   # x     (per batch)
        pl.BlockSpec((None, 1, T), lambda b: (b, 0, 0)),   # mask  (per batch)
        full((1, D)), full((1, D)),                        # norm1 gamma/beta
        full((1, D)), full((1, D)),                        # norm2 gamma/beta
        full((D, 3 * D)), full((1, 3 * D)),                # fused QKV w, b
        full((n_heads, dk, D)), full((1, D)),              # out-proj (head-major), bias
        full((D, Dff)), full((1, Dff)),                    # ffn w1, b1
        full((Dff, D)), full((1, D)),                      # ffn w2, b2
    ]
    out_spec = pl.BlockSpec((None, T, D), lambda b: (b, 0, 0))

    kernel = functools.partial(encoder_layer_kernel,
                               n_heads=n_heads, compute_dtype=cdt)
    out = pl.pallas_call(
        kernel,
        out_shape=jax.ShapeDtypeStruct((B, T, D), f32),
        grid_spec=pltpu.PrefetchScalarGridSpec(
            num_scalar_prefetch=0,
            grid=(B,),
            in_specs=in_specs,
            out_specs=out_spec,
            scratch_shapes=[
                pltpu.VMEM((n_heads, T, dk), cdt),   # q (pre-scaled)
                pltpu.VMEM((n_heads, T, dk), cdt),   # k
                pltpu.VMEM((n_heads, T, dk), cdt),   # v
            ],
        ),
        compiler_params=pltpu.CompilerParams(
            dimension_semantics=("parallel",),
            vmem_limit_bytes=64 * 1024 * 1024,
        ),
    )(x, mask,
      params["g1"], params["b1"], params["g2"], params["b2"],
      wqkv, bqkv, wo_h, params["bo"],
      w1c, params["bf1"], w2c, params["bf2"])
    return out, mask


# ----------------------------- pure-JAX reference ------------------------------
def ref_encoder_layer(x, mask, p, n_heads):
    B, T, D = x.shape
    dk = D // n_heads

    xn = _layer_norm(x, p["g1"], p["b1"])
    q = xn @ p["wq"] + p["bq"]
    k = xn @ p["wk"] + p["bk"]
    v = xn @ p["wv"] + p["bv"]
    qh = q.reshape(B, T, n_heads, dk).transpose(0, 2, 1, 3)
    kh = k.reshape(B, T, n_heads, dk).transpose(0, 2, 1, 3)
    vh = v.reshape(B, T, n_heads, dk).transpose(0, 2, 1, 3)
    scores = jnp.einsum("bhqd,bhkd->bhqk", qh, kh) / jnp.sqrt(jnp.float32(dk))
    keep = (mask[:, None, :, :] > 0)              # (B, 1, 1, T)
    scores = jnp.where(keep, scores, NEG_INF)
    attn = jax.nn.softmax(scores, axis=-1)
    attn = jnp.where(keep, attn, 0.0)
    ctx = jnp.einsum("bhqk,bhkd->bhqd", attn, vh).transpose(0, 2, 1, 3).reshape(B, T, D)
    att = ctx @ p["wo"] + p["bo"]
    x1 = x + att
    xn2 = _layer_norm(x1, p["g2"], p["b2"])
    ff = jnp.maximum(xn2 @ p["w1"] + p["bf1"], 0.0) @ p["w2"] + p["bf2"]
    return x1 + ff, mask


if __name__ == "__main__":
    B, T, D, H, DFF = 2, 8, 32, 4, 64

    key = jax.random.PRNGKey(0)
    keys = jax.random.split(key, 16)

    x = jax.random.normal(keys[0], (B, T, D), dtype=jnp.float32)
    # mask: keep everything except the last two key positions of batch 1
    mask = jnp.ones((B, 1, T), dtype=jnp.float32)
    mask = mask.at[1, 0, T - 2:].set(0.0)

    s = 0.1
    params = {
        "g1": jnp.ones((1, D), jnp.float32),
        "b1": jnp.zeros((1, D), jnp.float32),
        "g2": jnp.ones((1, D), jnp.float32),
        "b2": jnp.zeros((1, D), jnp.float32),
        "wq": s * jax.random.normal(keys[1], (D, D), jnp.float32),
        "bq": s * jax.random.normal(keys[2], (1, D), jnp.float32),
        "wk": s * jax.random.normal(keys[3], (D, D), jnp.float32),
        "bk": s * jax.random.normal(keys[4], (1, D), jnp.float32),
        "wv": s * jax.random.normal(keys[5], (D, D), jnp.float32),
        "bv": s * jax.random.normal(keys[6], (1, D), jnp.float32),
        "wo": s * jax.random.normal(keys[7], (D, D), jnp.float32),
        "bo": s * jax.random.normal(keys[8], (1, D), jnp.float32),
        "w1": s * jax.random.normal(keys[9], (D, DFF), jnp.float32),
        "bf1": s * jax.random.normal(keys[10], (1, DFF), jnp.float32),
        "w2": s * jax.random.normal(keys[11], (DFF, D), jnp.float32),
        "bf2": s * jax.random.normal(keys[12], (1, D), jnp.float32),
    }

    ref, _ = ref_encoder_layer(x, mask, params, n_heads=H)

    # 1) exact-semantics check: f32 MXU inputs (casts are no-ops)
    out_f32, _ = encoder_layer(x, mask, params, n_heads=H,
                               compute_dtype=jnp.float32)
    out_f32 = jax.block_until_ready(out_f32)
    assert out_f32.shape == (B, T, D)
    assert jnp.allclose(out_f32, ref, atol=5e-3, rtol=5e-3), (
        f"f32 max abs err = {jnp.max(jnp.abs(out_f32 - ref))}")

    # 2) production config: bf16 into the MXU, f32 accumulation / LN / softmax
    out_bf16, out_mask = encoder_layer(x, mask, params, n_heads=H)
    out_bf16 = jax.block_until_ready(out_bf16)
    assert out_bf16.shape == (B, T, D)
    assert jnp.allclose(out_bf16, ref, atol=5e-2, rtol=5e-2), (
        f"bf16 max abs err = {jnp.max(jnp.abs(out_bf16 - ref))}")

    print("KERNEL_OK")
</pallas_src>

<mosaic_0001>
module attributes {stable_mosaic.version = 11 : i64} {
  func.func @encoder_layer_kernel(%arg0: i32, %arg1: memref<1x8x32xf32, #tpu.memory_space<vmem>>, %arg2: memref<1x1x8xf32, #tpu.memory_space<vmem>>, %arg3: memref<1x32xf32, #tpu.memory_space<vmem>>, %arg4: memref<1x32xf32, #tpu.memory_space<vmem>>, %arg5: memref<1x32xf32, #tpu.memory_space<vmem>>, %arg6: memref<1x32xf32, #tpu.memory_space<vmem>>, %arg7: memref<32x96xf32, #tpu.memory_space<vmem>>, %arg8: memref<1x96xf32, #tpu.memory_space<vmem>>, %arg9: memref<4x8x32xf32, #tpu.memory_space<vmem>>, %arg10: memref<1x32xf32, #tpu.memory_space<vmem>>, %arg11: memref<32x64xf32, #tpu.memory_space<vmem>>, %arg12: memref<1x64xf32, #tpu.memory_space<vmem>>, %arg13: memref<64x32xf32, #tpu.memory_space<vmem>>, %arg14: memref<1x32xf32, #tpu.memory_space<vmem>>, %arg15: memref<1x8x32xf32, #tpu.memory_space<vmem>>, %arg16: memref<4x8x8xf32, #tpu.memory_space<vmem>>, %arg17: memref<4x8x8xf32, #tpu.memory_space<vmem>>, %arg18: memref<4x8x8xf32, #tpu.memory_space<vmem>>) attributes {dimension_semantics = [#tpu.dimension_semantics<parallel>], iteration_bounds = array<i64: 2>, scalar_prefetch = 0 : i64, scratch_operands = 3 : i64, tpu.core_type = #tpu.core_type<tc>, window_params = [{transform_indices = @transform_0, window_bounds = array<i64: 1, 8, 32>}, {transform_indices = @transform_1, window_bounds = array<i64: 1, 1, 8>}, {pipeline_mode = #tpu.pipeline_mode<synchronous>, transform_indices = @transform_2, window_bounds = array<i64: 1, 32>}, {pipeline_mode = #tpu.pipeline_mode<synchronous>, transform_indices = @transform_3, window_bounds = array<i64: 1, 32>}, {pipeline_mode = #tpu.pipeline_mode<synchronous>, transform_indices = @transform_4, window_bounds = array<i64: 1, 32>}, {pipeline_mode = #tpu.pipeline_mode<synchronous>, transform_indices = @transform_5, window_bounds = array<i64: 1, 32>}, {pipeline_mode = #tpu.pipeline_mode<synchronous>, transform_indices = @transform_6, window_bounds = array<i64: 32, 96>}, {pipeline_mode = #tpu.pipeline_mode<synchronous>, transform_indices = @transform_7, window_bounds = array<i64: 1, 96>}, {pipeline_mode = #tpu.pipeline_mode<synchronous>, transform_indices = @transform_8, window_bounds = array<i64: 4, 8, 32>}, {pipeline_mode = #tpu.pipeline_mode<synchronous>, transform_indices = @transform_9, window_bounds = array<i64: 1, 32>}, {pipeline_mode = #tpu.pipeline_mode<synchronous>, transform_indices = @transform_10, window_bounds = array<i64: 32, 64>}, {pipeline_mode = #tpu.pipeline_mode<synchronous>, transform_indices = @transform_11, window_bounds = array<i64: 1, 64>}, {pipeline_mode = #tpu.pipeline_mode<synchronous>, transform_indices = @transform_12, window_bounds = array<i64: 64, 32>}, {pipeline_mode = #tpu.pipeline_mode<synchronous>, transform_indices = @transform_13, window_bounds = array<i64: 1, 32>}, {transform_indices = @transform_14, window_bounds = array<i64: 1, 8, 32>}]} {
    %c0 = arith.constant 0 : index
    %c0_0 = arith.constant 0 : index
    %c0_1 = arith.constant 0 : index
    %0 = vector.load %arg1[%c0, %c0_0, %c0_1] : memref<1x8x32xf32, #tpu.memory_space<vmem>>, vector<1x8x32xf32>
    %1 = vector.shape_cast %0 : vector<1x8x32xf32> to vector<8x32xf32>
    %c0_2 = arith.constant 0 : index
    %c0_3 = arith.constant 0 : index
    %c0_4 = arith.constant 0 : index
    %2 = vector.load %arg2[%c0_2, %c0_3, %c0_4] : memref<1x1x8xf32, #tpu.memory_space<vmem>>, vector<1x1x8xf32>
    %3 = vector.shape_cast %2 : vector<1x1x8xf32> to vector<1x8xf32>
    %cst = arith.constant 0.000000e+00 : f32
    %4 = vector.broadcast %cst : f32 to vector<1x8xf32>
    %5 = arith.cmpf ogt, %3, %4 : vector<1x8xf32>
    %c0_5 = arith.constant 0 : index
    %c0_6 = arith.constant 0 : index
    %6 = vector.load %arg3[%c0_5, %c0_6] : memref<1x32xf32, #tpu.memory_space<vmem>>, vector<1x32xf32>
    %c0_7 = arith.constant 0 : index
    %c0_8 = arith.constant 0 : index
    %7 = vector.load %arg4[%c0_7, %c0_8] : memref<1x32xf32, #tpu.memory_space<vmem>>, vector<1x32xf32>
    %cst_9 = arith.constant dense<0.000000e+00> : vector<8xf32>
    %8 = vector.multi_reduction <add>, %1, %cst_9 [1] : vector<8x32xf32> to vector<8xf32>
    %9 = vector.shape_cast %8 : vector<8xf32> to vector<8x1xf32>
    %cst_10 = arith.constant 3.200000e+01 : f32
    %10 = vector.broadcast %cst_10 : f32 to vector<8x1xf32>
    %11 = arith.divf %9, %10 : vector<8x1xf32>
    %12 = vector.broadcast %11 : vector<8x1xf32> to vector<8x32xf32>
    %13 = arith.subf %1, %12 : vector<8x32xf32>
    %14 = arith.mulf %13, %13 : vector<8x32xf32>
    %cst_11 = arith.constant dense<0.000000e+00> : vector<8xf32>
    %15 = vector.multi_reduction <add>, %14, %cst_11 [1] : vector<8x32xf32> to vector<8xf32>
    %16 = vector.shape_cast %15 : vector<8xf32> to vector<8x1xf32>
    %cst_12 = arith.constant 3.200000e+01 : f32
    %17 = vector.broadcast %cst_12 : f32 to vector<8x1xf32>
    %18 = arith.divf %16, %17 : vector<8x1xf32>
    %19 = vector.broadcast %11 : vector<8x1xf32> to vector<8x32xf32>
    %20 = arith.subf %1, %19 : vector<8x32xf32>
    %cst_13 = arith.constant 9.99999996E-13 : f32
    %21 = vector.broadcast %cst_13 : f32 to vector<8x1xf32>
    %22 = arith.addf %18, %21 : vector<8x1xf32>
    %23 = math.rsqrt %22 : vector<8x1xf32>
    %24 = vector.broadcast %23 : vector<8x1xf32> to vector<8x32xf32>
    %25 = arith.mulf %20, %24 : vector<8x32xf32>
    %26 = vector.broadcast %6 : vector<1x32xf32> to vector<8x32xf32>
    %27 = arith.mulf %25, %26 : vector<8x32xf32>
    %28 = vector.broadcast %7 : vector<1x32xf32> to vector<8x32xf32>
    %29 = arith.addf %27, %28 : vector<8x32xf32>
    %c0_14 = arith.constant 0 : index
    %c0_15 = arith.constant 0 : index
    %30 = vector.load %arg7[%c0_14, %c0_15] : memref<32x96xf32, #tpu.memory_space<vmem>>, vector<32x96xf32>
    %cst_16 = arith.constant dense<0.000000e+00> : vector<8x96xf32>
    %31 = tpu.matmul %29, %30, %cst_16 {dimension_numbers = #tpu.dot_dimension_numbers<[1], [0], [0], [1], [0, 0, 1, 1], [], []>} : vector<8x32xf32>, vector<32x96xf32>, vector<8x96xf32> -> vector<8x96xf32>
    %c0_17 = arith.constant 0 : index
    %c0_18 = arith.constant 0 : index
    %32 = vector.load %arg8[%c0_17, %c0_18] : memref<1x96xf32, #tpu.memory_space<vmem>>, vector<1x96xf32>
    %33 = vector.broadcast %32 : vector<1x96xf32> to vector<8x96xf32>
    %34 = arith.addf %31, %33 : vector<8x96xf32>
    %35 = vector.extract_strided_slice %34 {offsets = [0, 0], sizes = [8, 8], strides = [1, 1]} : vector<8x96xf32> to vector<8x8xf32>
    %cst_19 = arith.constant 0.353553385 : f32
    %36 = vector.broadcast %cst_19 : f32 to vector<8x8xf32>
    %37 = arith.mulf %35, %36 : vector<8x8xf32>
    %c0_20 = arith.constant 0 : index
    %c0_21 = arith.constant 0 : index
    %c0_22 = arith.constant 0 : index
    %38 = vector.load %arg16[%c0_20, %c0_21, %c0_22] : memref<4x8x8xf32, #tpu.memory_space<vmem>>, vector<1x8x8xf32>
    %39 = vector.shape_cast %38 : vector<1x8x8xf32> to vector<8x8xf32>
    %40 = vector.shape_cast %37 : vector<8x8xf32> to vector<1x8x8xf32>
    tpu.vector_store %arg16[%c0_20, %c0_21, %c0_22], %40 {strides = array<i32>} : memref<4x8x8xf32, #tpu.memory_space<vmem>>, vector<1x8x8xf32>,
    %41 = vector.extract_strided_slice %34 {offsets = [0, 32], sizes = [8, 8], strides = [1, 1]} : vector<8x96xf32> to vector<8x8xf32>
    %c0_23 = arith.constant 0 : index
    %c0_24 = arith.constant 0 : index
    %c0_25 = arith.constant 0 : index
    %42 = vector.load %arg17[%c0_23, %c0_24, %c0_25] : memref<4x8x8xf32, #tpu.memory_space<vmem>>, vector<1x8x8xf32>
    %43 = vector.shape_cast %42 : vector<1x8x8xf32> to vector<8x8xf32>
    %44 = vector.shape_cast %41 : vector<8x8xf32> to vector<1x8x8xf32>
    tpu.vector_store %arg17[%c0_23, %c0_24, %c0_25], %44 {strides = array<i32>} : memref<4x8x8xf32, #tpu.memory_space<vmem>>, vector<1x8x8xf32>,
    %45 = vector.extract_strided_slice %34 {offsets = [0, 64], sizes = [8, 8], strides = [1, 1]} : vector<8x96xf32> to vector<8x8xf32>
    %c0_26 = arith.constant 0 : index
    %c0_27 = arith.constant 0 : index
    %c0_28 = arith.constant 0 : index
    %46 = vector.load %arg18[%c0_26, %c0_27, %c0_28] : memref<4x8x8xf32, #tpu.memory_space<vmem>>, vector<1x8x8xf32>
    %47 = vector.shape_cast %46 : vector<1x8x8xf32> to vector<8x8xf32>
    %48 = vector.shape_cast %45 : vector<8x8xf32> to vector<1x8x8xf32>
    tpu.vector_store %arg18[%c0_26, %c0_27, %c0_28], %48 {strides = array<i32>} : memref<4x8x8xf32, #tpu.memory_space<vmem>>, vector<1x8x8xf32>,
    %49 = vector.extract_strided_slice %34 {offsets = [0, 8], sizes = [8, 8], strides = [1, 1]} : vector<8x96xf32> to vector<8x8xf32>
    %cst_29 = arith.constant 0.353553385 : f32
    %50 = vector.broadcast %cst_29 : f32 to vector<8x8xf32>
    %51 = arith.mulf %49, %50 : vector<8x8xf32>
    %c1 = arith.constant 1 : index
    %c0_30 = arith.constant 0 : index
    %c0_31 = arith.constant 0 : index
    %52 = vector.load %arg16[%c1, %c0_30, %c0_31] : memref<4x8x8xf32, #tpu.memory_space<vmem>>, vector<1x8x8xf32>
    %53 = vector.shape_cast %52 : vector<1x8x8xf32> to vector<8x8xf32>
    %54 = vector.shape_cast %51 : vector<8x8xf32> to vector<1x8x8xf32>
    tpu.vector_store %arg16[%c1, %c0_30, %c0_31], %54 {strides = array<i32>} : memref<4x8x8xf32, #tpu.memory_space<vmem>>, vector<1x8x8xf32>,
    %55 = vector.extract_strided_slice %34 {offsets = [0, 40], sizes = [8, 8], strides = [1, 1]} : vector<8x96xf32> to vector<8x8xf32>
    %c1_32 = arith.constant 1 : index
    %c0_33 = arith.constant 0 : index
    %c0_34 = arith.constant 0 : index
    %56 = vector.load %arg17[%c1_32, %c0_33, %c0_34] : memref<4x8x8xf32, #tpu.memory_space<vmem>>, vector<1x8x8xf32>
    %57 = vector.shape_cast %56 : vector<1x8x8xf32> to vector<8x8xf32>
    %58 = vector.shape_cast %55 : vector<8x8xf32> to vector<1x8x8xf32>
    tpu.vector_store %arg17[%c1_32, %c0_33, %c0_34], %58 {strides = array<i32>} : memref<4x8x8xf32, #tpu.memory_space<vmem>>, vector<1x8x8xf32>,
    %59 = vector.extract_strided_slice %34 {offsets = [0, 72], sizes = [8, 8], strides = [1, 1]} : vector<8x96xf32> to vector<8x8xf32>
    %c1_35 = arith.constant 1 : index
    %c0_36 = arith.constant 0 : index
    %c0_37 = arith.constant 0 : index
    %60 = vector.load %arg18[%c1_35, %c0_36, %c0_37] : memref<4x8x8xf32, #tpu.memory_space<vmem>>, vector<1x8x8xf32>
    %61 = vector.shape_cast %60 : vector<1x8x8xf32> to vector<8x8xf32>
    %62 = vector.shape_cast %59 : vector<8x8xf32> to vector<1x8x8xf32>
    tpu.vector_store %arg18[%c1_35, %c0_36, %c0_37], %62 {strides = array<i32>} : memref<4x8x8xf32, #tpu.memory_space<vmem>>, vector<1x8x8xf32>,
    %63 = vector.extract_strided_slice %34 {offsets = [0, 16], sizes = [8, 8], strides = [1, 1]} : vector<8x96xf32> to vector<8x8xf32>
    %cst_38 = arith.constant 0.353553385 : f32
    %64 = vector.broadcast %cst_38 : f32 to vector<8x8xf32>
    %65 = arith.mulf %63, %64 : vector<8x8xf32>
    %c2 = arith.constant 2 : index
    %c0_39 = arith.constant 0 : index
    %c0_40 = arith.constant 0 : index
    %66 = vector.load %arg16[%c2, %c0_39, %c0_40] : memref<4x8x8xf32, #tpu.memory_space<vmem>>, vector<1x8x8xf32>
    %67 = vector.shape_cast %66 : vector<1x8x8xf32> to vector<8x8xf32>
    %68 = vector.shape_cast %65 : vector<8x8xf32> to vector<1x8x8xf32>
    tpu.vector_store %arg16[%c2, %c0_39, %c0_40], %68 {strides = array<i32>} : memref<4x8x8xf32, #tpu.memory_space<vmem>>, vector<1x8x8xf32>,
    %69 = vector.extract_strided_slice %34 {offsets = [0, 48], sizes = [8, 8], strides = [1, 1]} : vector<8x96xf32> to vector<8x8xf32>
    %c2_41 = arith.constant 2 : index
    %c0_42 = arith.constant 0 : index
    %c0_43 = arith.constant 0 : index
    %70 = vector.load %arg17[%c2_41, %c0_42, %c0_43] : memref<4x8x8xf32, #tpu.memory_space<vmem>>, vector<1x8x8xf32>
    %71 = vector.shape_cast %70 : vector<1x8x8xf32> to vector<8x8xf32>
    %72 = vector.shape_cast %69 : vector<8x8xf32> to vector<1x8x8xf32>
    tpu.vector_store %arg17[%c2_41, %c0_42, %c0_43], %72 {strides = array<i32>} : memref<4x8x8xf32, #tpu.memory_space<vmem>>, vector<1x8x8xf32>,
    %73 = vector.extract_strided_slice %34 {offsets = [0, 80], sizes = [8, 8], strides = [1, 1]} : vector<8x96xf32> to vector<8x8xf32>
    %c2_44 = arith.constant 2 : index
    %c0_45 = arith.constant 0 : index
    %c0_46 = arith.constant 0 : index
    %74 = vector.load %arg18[%c2_44, %c0_45, %c0_46] : memref<4x8x8xf32, #tpu.memory_space<vmem>>, vector<1x8x8xf32>
    %75 = vector.shape_cast %74 : vector<1x8x8xf32> to vector<8x8xf32>
    %76 = vector.shape_cast %73 : vector<8x8xf32> to vector<1x8x8xf32>
    tpu.vector_store %arg18[%c2_44, %c0_45, %c0_46], %76 {strides = array<i32>} : memref<4x8x8xf32, #tpu.memory_space<vmem>>, vector<1x8x8xf32>,
    %77 = vector.extract_strided_slice %34 {offsets = [0, 24], sizes = [8, 8], strides = [1, 1]} : vector<8x96xf32> to vector<8x8xf32>
    %cst_47 = arith.constant 0.353553385 : f32
    %78 = vector.broadcast %cst_47 : f32 to vector<8x8xf32>
    %79 = arith.mulf %77, %78 : vector<8x8xf32>
    %c3 = arith.constant 3 : index
    %c0_48 = arith.constant 0 : index
    %c0_49 = arith.constant 0 : index
    %80 = vector.load %arg16[%c3, %c0_48, %c0_49] : memref<4x8x8xf32, #tpu.memory_space<vmem>>, vector<1x8x8xf32>
    %81 = vector.shape_cast %80 : vector<1x8x8xf32> to vector<8x8xf32>
    %82 = vector.shape_cast %79 : vector<8x8xf32> to vector<1x8x8xf32>
    tpu.vector_store %arg16[%c3, %c0_48, %c0_49], %82 {strides = array<i32>} : memref<4x8x8xf32, #tpu.memory_space<vmem>>, vector<1x8x8xf32>,
    %83 = vector.extract_strided_slice %34 {offsets = [0, 56], sizes = [8, 8], strides = [1, 1]} : vector<8x96xf32> to vector<8x8xf32>
    %c3_50 = arith.constant 3 : index
    %c0_51 = arith.constant 0 : index
    %c0_52 = arith.constant 0 : index
    %84 = vector.load %arg17[%c3_50, %c0_51, %c0_52] : memref<4x8x8xf32, #tpu.memory_space<vmem>>, vector<1x8x8xf32>
    %85 = vector.shape_cast %84 : vector<1x8x8xf32> to vector<8x8xf32>
    %86 = vector.shape_cast %83 : vector<8x8xf32> to vector<1x8x8xf32>
    tpu.vector_store %arg17[%c3_50, %c0_51, %c0_52], %86 {strides = array<i32>} : memref<4x8x8xf32, #tpu.memory_space<vmem>>, vector<1x8x8xf32>,
    %87 = vector.extract_strided_slice %34 {offsets = [0, 88], sizes = [8, 8], strides = [1, 1]} : vector<8x96xf32> to vector<8x8xf32>
    %c3_53 = arith.constant 3 : index
    %c0_54 = arith.constant 0 : index
    %c0_55 = arith.constant 0 : index
    %88 = vector.load %arg18[%c3_53, %c0_54, %c0_55] : memref<4x8x8xf32, #tpu.memory_space<vmem>>, vector<1x8x8xf32>
    %89 = vector.shape_cast %88 : vector<1x8x8xf32> to vector<8x8xf32>
    %90 = vector.shape_cast %87 : vector<8x8xf32> to vector<1x8x8xf32>
    tpu.vector_store %arg18[%c3_53, %c0_54, %c0_55], %90 {strides = array<i32>} : memref<4x8x8xf32, #tpu.memory_space<vmem>>, vector<1x8x8xf32>,
    %cst_56 = arith.constant 0.000000e+00 : f32
    %91 = vector.broadcast %cst_56 : f32 to vector<8x32xf32>
    %c0_i32 = arith.constant 0 : i32
    %c4_i32 = arith.constant 4 : i32
    %92 = arith.addi %c0_i32, %c4_i32 : i32
    %c1_i32 = arith.constant 1 : i32
    %93 = scf.for %arg19 = %c0_i32 to %92 step %c1_i32 iter_args(%arg20 = %91) -> (vector<8x32xf32>)  : i32 {
      %138 = arith.index_cast %arg19 : i32 to index
      %c0_83 = arith.constant 0 : index
      %c0_84 = arith.constant 0 : index
      %139 = vector.load %arg16[%138, %c0_83, %c0_84] : memref<4x8x8xf32, #tpu.memory_space<vmem>>, vector<1x8x8xf32>
      %140 = vector.shape_cast %139 : vector<1x8x8xf32> to vector<8x8xf32>
      %141 = arith.index_cast %arg19 : i32 to index
      %c0_85 = arith.constant 0 : index
      %c0_86 = arith.constant 0 : index
      %142 = vector.load %arg17[%141, %c0_85, %c0_86] : memref<4x8x8xf32, #tpu.memory_space<vmem>>, vector<1x8x8xf32>
      %143 = vector.shape_cast %142 : vector<1x8x8xf32> to vector<8x8xf32>
      %144 = arith.index_cast %arg19 : i32 to index
      %c0_87 = arith.constant 0 : index
      %c0_88 = arith.constant 0 : index
      %145 = vector.load %arg18[%144, %c0_87, %c0_88] : memref<4x8x8xf32, #tpu.memory_space<vmem>>, vector<1x8x8xf32>
      %146 = vector.shape_cast %145 : vector<1x8x8xf32> to vector<8x8xf32>
      %cst_89 = arith.constant dense<0.000000e+00> : vector<8x8xf32>
      %147 = tpu.matmul %140, %143, %cst_89 {dimension_numbers = #tpu.dot_dimension_numbers<[1], [1], [0], [0], [0, 0, 1, 0], [], []>} : vector<8x8xf32>, vector<8x8xf32>, vector<8x8xf32> -> vector<8x8xf32>
      %cst_90 = arith.constant -3.40282347E+38 : f32
      %148 = vector.shape_cast %5 : vector<1x8xi1> to vector<1x8xi1>
      %149 = vector.broadcast %148 : vector<1x8xi1> to vector<8x8xi1>
      %150 = vector.broadcast %cst_90 : f32 to vector<8x8xf32>
      %151 = arith.select %149, %147, %150 : vector<8x8xi1>, vector<8x8xf32>
      %cst_91 = arith.constant dense<0xFF800000> : vector<8xf32>
      %152 = vector.multi_reduction <maximumf>, %151, %cst_91 [1] : vector<8x8xf32> to vector<8xf32>
      %153 = vector.shape_cast %152 : vector<8xf32> to vector<8x1xf32>
      %154 = vector.broadcast %153 : vector<8x1xf32> to vector<8x8xf32>
      %155 = arith.subf %151, %154 : vector<8x8xf32>
      %156 = math.exp %155 : vector<8x8xf32>
      %cst_92 = arith.constant dense<0.000000e+00> : vector<8xf32>
      %157 = vector.multi_reduction <add>, %156, %cst_92 [1] : vector<8x8xf32> to vector<8xf32>
      %158 = vector.shape_cast %157 : vector<8xf32> to vector<8x1xf32>
      %159 = tpu.reciprocal %158 {approx = true} : vector<8x1xf32> -> vector<8x1xf32>
      %160 = vector.broadcast %159 : vector<8x1xf32> to vector<8x8xf32>
      %161 = arith.mulf %156, %160 : vector<8x8xf32>
      %cst_93 = arith.constant 0.000000e+00 : f32
      %162 = vector.shape_cast %5 : vector<1x8xi1> to vector<1x8xi1>
      %163 = vector.broadcast %162 : vector<1x8xi1> to vector<8x8xi1>
      %164 = vector.broadcast %cst_93 : f32 to vector<8x8xf32>
      %165 = arith.select %163, %161, %164 : vector<8x8xi1>, vector<8x8xf32>
      %cst_94 = arith.constant dense<0.000000e+00> : vector<8x8xf32>
      %166 = tpu.matmul %165, %146, %cst_94 {dimension_numbers = #tpu.dot_dimension_numbers<[1], [0], [0], [1], [0, 0, 1, 1], [], []>} : vector<8x8xf32>, vector<8x8xf32>, vector<8x8xf32> -> vector<8x8xf32>
      %167 = arith.index_cast %arg19 : i32 to index
      %c0_95 = arith.constant 0 : index
      %c0_96 = arith.constant 0 : index
      %168 = vector.load %arg9[%167, %c0_95, %c0_96] : memref<4x8x32xf32, #tpu.memory_space<vmem>>, vector<1x8x32xf32>
      %169 = vector.shape_cast %168 : vector<1x8x32xf32> to vector<8x32xf32>
      %cst_97 = arith.constant dense<0.000000e+00> : vector<8x32xf32>
      %170 = tpu.matmul %166, %169, %cst_97 {dimension_numbers = #tpu.dot_dimension_numbers<[1], [0], [0], [1], [0, 0, 1, 1], [], []>} : vector<8x8xf32>, vector<8x32xf32>, vector<8x32xf32> -> vector<8x32xf32>
      %171 = arith.addf %arg20, %170 : vector<8x32xf32>
      scf.yield %171 : vector<8x32xf32>
    }
    %c4_i32_57 = arith.constant 4 : i32
    %c0_58 = arith.constant 0 : index
    %c0_59 = arith.constant 0 : index
    %94 = vector.load %arg10[%c0_58, %c0_59] : memref<1x32xf32, #tpu.memory_space<vmem>>, vector<1x32xf32>
    %95 = vector.broadcast %94 : vector<1x32xf32> to vector<8x32xf32>
    %96 = arith.addf %93, %95 : vector<8x32xf32>
    %97 = arith.addf %1, %96 : vector<8x32xf32>
    %c0_60 = arith.constant 0 : index
    %c0_61 = arith.constant 0 : index
    %98 = vector.load %arg5[%c0_60, %c0_61] : memref<1x32xf32, #tpu.memory_space<vmem>>, vector<1x32xf32>
    %c0_62 = arith.constant 0 : index
    %c0_63 = arith.constant 0 : index
    %99 = vector.load %arg6[%c0_62, %c0_63] : memref<1x32xf32, #tpu.memory_space<vmem>>, vector<1x32xf32>
    %cst_64 = arith.constant dense<0.000000e+00> : vector<8xf32>
    %100 = vector.multi_reduction <add>, %97, %cst_64 [1] : vector<8x32xf32> to vector<8xf32>
    %101 = vector.shape_cast %100 : vector<8xf32> to vector<8x1xf32>
    %cst_65 = arith.constant 3.200000e+01 : f32
    %102 = vector.broadcast %cst_65 : f32 to vector<8x1xf32>
    %103 = arith.divf %101, %102 : vector<8x1xf32>
    %104 = vector.broadcast %103 : vector<8x1xf32> to vector<8x32xf32>
    %105 = arith.subf %97, %104 : vector<8x32xf32>
    %106 = arith.mulf %105, %105 : vector<8x32xf32>
    %cst_66 = arith.constant dense<0.000000e+00> : vector<8xf32>
    %107 = vector.multi_reduction <add>, %106, %cst_66 [1] : vector<8x32xf32> to vector<8xf32>
    %108 = vector.shape_cast %107 : vector<8xf32> to vector<8x1xf32>
    %cst_67 = arith.constant 3.200000e+01 : f32
    %109 = vector.broadcast %cst_67 : f32 to vector<8x1xf32>
    %110 = arith.divf %108, %109 : vector<8x1xf32>
    %111 = vector.broadcast %103 : vector<8x1xf32> to vector<8x32xf32>
    %112 = arith.subf %97, %111 : vector<8x32xf32>
    %cst_68 = arith.constant 9.99999996E-13 : f32
    %113 = vector.broadcast %cst_68 : f32 to vector<8x1xf32>
    %114 = arith.addf %110, %113 : vector<8x1xf32>
    %115 = math.rsqrt %114 : vector<8x1xf32>
    %116 = vector.broadcast %115 : vector<8x1xf32> to vector<8x32xf32>
    %117 = arith.mulf %112, %116 : vector<8x32xf32>
    %118 = vector.broadcast %98 : vector<1x32xf32> to vector<8x32xf32>
    %119 = arith.mulf %117, %118 : vector<8x32xf32>
    %120 = vector.broadcast %99 : vector<1x32xf32> to vector<8x32xf32>
    %121 = arith.addf %119, %120 : vector<8x32xf32>
    %c0_69 = arith.constant 0 : index
    %c0_70 = arith.constant 0 : index
    %122 = vector.load %arg11[%c0_69, %c0_70] : memref<32x64xf32, #tpu.memory_space<vmem>>, vector<32x64xf32>
    %cst_71 = arith.constant dense<0.000000e+00> : vector<8x64xf32>
    %123 = tpu.matmul %121, %122, %cst_71 {dimension_numbers = #tpu.dot_dimension_numbers<[1], [0], [0], [1], [0, 0, 1, 1], [], []>} : vector<8x32xf32>, vector<32x64xf32>, vector<8x64xf32> -> vector<8x64xf32>
    %c0_72 = arith.constant 0 : index
    %c0_73 = arith.constant 0 : index
    %124 = vector.load %arg12[%c0_72, %c0_73] : memref<1x64xf32, #tpu.memory_space<vmem>>, vector<1x64xf32>
    %125 = vector.broadcast %124 : vector<1x64xf32> to vector<8x64xf32>
    %126 = arith.addf %123, %125 : vector<8x64xf32>
    %cst_74 = arith.constant 0.000000e+00 : f32
    %127 = vector.broadcast %cst_74 : f32 to vector<8x64xf32>
    %128 = arith.maximumf %126, %127 : vector<8x64xf32>
    %c0_75 = arith.constant 0 : index
    %c0_76 = arith.constant 0 : index
    %129 = vector.load %arg13[%c0_75, %c0_76] : memref<64x32xf32, #tpu.memory_space<vmem>>, vector<64x32xf32>
    %cst_77 = arith.constant dense<0.000000e+00> : vector<8x32xf32>
    %130 = tpu.matmul %128, %129, %cst_77 {dimension_numbers = #tpu.dot_dimension_numbers<[1], [0], [0], [1], [0, 0, 1, 1], [], []>} : vector<8x64xf32>, vector<64x32xf32>, vector<8x32xf32> -> vector<8x32xf32>
    %c0_78 = arith.constant 0 : index
    %c0_79 = arith.constant 0 : index
    %131 = vector.load %arg14[%c0_78, %c0_79] : memref<1x32xf32, #tpu.memory_space<vmem>>, vector<1x32xf32>
    %132 = vector.broadcast %131 : vector<1x32xf32> to vector<8x32xf32>
    %133 = arith.addf %130, %132 : vector<8x32xf32>
    %134 = arith.addf %97, %133 : vector<8x32xf32>
    %c0_80 = arith.constant 0 : index
    %c0_81 = arith.constant 0 : index
    %c0_82 = arith.constant 0 : index
    %135 = vector.load %arg15[%c0_80, %c0_81, %c0_82] : memref<1x8x32xf32, #tpu.memory_space<vmem>>, vector<1x8x32xf32>
    %136 = vector.shape_cast %135 : vector<1x8x32xf32> to vector<8x32xf32>
    %137 = vector.shape_cast %134 : vector<8x32xf32> to vector<1x8x32xf32>
    tpu.vector_store %arg15[%c0_80, %c0_81, %c0_82], %137 {strides = array<i32>} : memref<1x8x32xf32, #tpu.memory_space<vmem>>, vector<1x8x32xf32>,
    return
  }
  func.func @transform_0(%arg0: i32) -> (i32, i32, i32) {
    %c0_i32 = arith.constant 0 : i32
    %c0_i32_0 = arith.constant 0 : i32
    %c0_i32_1 = arith.constant 0 : i32
    return %arg0, %c0_i32, %c0_i32_0 : i32, i32, i32
  }
  func.func @transform_1(%arg0: i32) -> (i32, i32, i32) {
    %c0_i32 = arith.constant 0 : i32
    %c0_i32_0 = arith.constant 0 : i32
    %c0_i32_1 = arith.constant 0 : i32
    return %arg0, %c0_i32, %c0_i32_0 : i32, i32, i32
  }
  func.func @transform_2(%arg0: i32) -> (i32, i32) {
    %c0_i32 = arith.constant 0 : i32
    %c0_i32_0 = arith.constant 0 : i32
    %c0_i32_1 = arith.constant 0 : i32
    return %c0_i32, %c0_i32_0 : i32, i32
  }
  func.func @transform_3(%arg0: i32) -> (i32, i32) {
    %c0_i32 = arith.constant 0 : i32
    %c0_i32_0 = arith.constant 0 : i32
    %c0_i32_1 = arith.constant 0 : i32
    return %c0_i32, %c0_i32_0 : i32, i32
  }
  func.func @transform_4(%arg0: i32) -> (i32, i32) {
    %c0_i32 = arith.constant 0 : i32
    %c0_i32_0 = arith.constant 0 : i32
    %c0_i32_1 = arith.constant 0 : i32
    return %c0_i32, %c0_i32_0 : i32, i32
  }
  func.func @transform_5(%arg0: i32) -> (i32, i32) {
    %c0_i32 = arith.constant 0 : i32
    %c0_i32_0 = arith.constant 0 : i32
    %c0_i32_1 = arith.constant 0 : i32
    return %c0_i32, %c0_i32_0 : i32, i32
  }
  func.func @transform_6(%arg0: i32) -> (i32, i32) {
    %c0_i32 = arith.constant 0 : i32
    %c0_i32_0 = arith.constant 0 : i32
    %c0_i32_1 = arith.constant 0 : i32
    return %c0_i32, %c0_i32_0 : i32, i32
  }
  func.func @transform_7(%arg0: i32) -> (i32, i32) {
    %c0_i32 = arith.constant 0 : i32
    %c0_i32_0 = arith.constant 0 : i32
    %c0_i32_1 = arith.constant 0 : i32
    return %c0_i32, %c0_i32_0 : i32, i32
  }
  func.func @transform_8(%arg0: i32) -> (i32, i32, i32) {
    %c0_i32 = arith.constant 0 : i32
    %c0_i32_0 = arith.constant 0 : i32
    %c0_i32_1 = arith.constant 0 : i32
    %c0_i32_2 = arith.constant 0 : i32
    return %c0_i32, %c0_i32_0, %c0_i32_1 : i32, i32, i32
  }
  func.func @transform_9(%arg0: i32) -> (i32, i32) {
    %c0_i32 = arith.constant 0 : i32
    %c0_i32_0 = arith.constant 0 : i32
    %c0_i32_1 = arith.constant 0 : i32
    return %c0_i32, %c0_i32_0 : i32, i32
  }
  func.func @transform_10(%arg0: i32) -> (i32, i32) {
    %c0_i32 = arith.constant 0 : i32
    %c0_i32_0 = arith.constant 0 : i32
    %c0_i32_1 = arith.constant 0 : i32
    return %c0_i32, %c0_i32_0 : i32, i32
  }
  func.func @transform_11(%arg0: i32) -> (i32, i32) {
    %c0_i32 = arith.constant 0 : i32
    %c0_i32_0 = arith.constant 0 : i32
    %c0_i32_1 = arith.constant 0 : i32
    return %c0_i32, %c0_i32_0 : i32, i32
  }
  func.func @transform_12(%arg0: i32) -> (i32, i32) {
    %c0_i32 = arith.constant 0 : i32
    %c0_i32_0 = arith.constant 0 : i32
    %c0_i32_1 = arith.constant 0 : i32
    return %c0_i32, %c0_i32_0 : i32, i32
  }
  func.func @transform_13(%arg0: i32) -> (i32, i32) {
    %c0_i32 = arith.constant 0 : i32
    %c0_i32_0 = arith.constant 0 : i32
    %c0_i32_1 = arith.constant 0 : i32
    return %c0_i32, %c0_i32_0 : i32, i32
  }
  func.func @transform_14(%arg0: i32) -> (i32, i32, i32) {
    %c0_i32 = arith.constant 0 : i32
    %c0_i32_0 = arith.constant 0 : i32
    %c0_i32_1 = arith.constant 0 : i32
    return %arg0, %c0_i32, %c0_i32_0 : i32, i32, i32
  }
}

</mosaic_0001>

<bundles_post_ra>
// kernel: tpu_custom_call.1
= control target key start
LH: loop header
LB: loop body
LE: loop exit
PB: predicated region body
PF: predicated region fallthrough
CT: control target
= control target key end

     0   :  { %s3149_s0 = inlined_call_operand.hbm [shape: f32[2,8,32], index: 0, kind: input, shape index: {}]   ;;  %s3150_s1 = inlined_call_operand.hbm [shape: f32[2,1,8], index: 1, kind: input, shape index: {}]   ;;  %s3151_s2 = inlined_call_operand.hbm [shape: f32[1,32], index: 2, kind: input, shape index: {}]   ;;  %s3152_s3 = inlined_call_operand.hbm [shape: f32[1,32], index: 3, kind: input, shape index: {}]   ;;  %s3153_s4 = inlined_call_operand.hbm [shape: f32[1,32], index: 4, kind: input, shape index: {}]   ;;  %s3154_s5 = inlined_call_operand.hbm [shape: f32[1,32], index: 5, kind: input, shape index: {}]   ;;  %s3155_s6 = inlined_call_operand.hbm [shape: f32[32,96], index: 6, kind: input, shape index: {}]   ;;  %s3156_s7 = inlined_call_operand.hbm [shape: f32[1,96], index: 7, kind: input, shape index: {}]   ;;  %s3157_s8 = inlined_call_operand.hbm [shape: f32[4,8,32], index: 8, kind: input, shape index: {}]   ;;  %s3158_s9 = inlined_call_operand.hbm [shape: f32[1,32], index: 9, kind: input, shape index: {}]   ;;  %s3159_s10 = inlined_call_operand.hbm [shape: f32[32,64], index: 10, kind: input, shape index: {}]   ;;  %s3160_s11 = inlined_call_operand.hbm [shape: f32[1,64], index: 11, kind: input, shape index: {}]   ;;  %s3161_s12 = inlined_call_operand.hbm [shape: f32[64,32], index: 12, kind: input, shape index: {}]   ;;  %s3162_s13 = inlined_call_operand.hbm [shape: f32[1,32], index: 13, kind: input, shape index: {}]   ;;  %s3163_s14 = inlined_call_operand.hbm [shape: f32[2,8,32], index: 14, kind: output, shape index: {}]  }
   0x1   :  { %3176 = sst [smem:[#allocation41_spill]] %s3149_s0 }
   0x2   :  { %3177 = sst [smem:[#allocation42_spill]] %s3150_s1 }
   0x3   :  { %3178 = sst [smem:[#allocation43_spill]] %s3151_s2 }
   0x4   :  { %3179 = sst [smem:[#allocation44_spill]] %s3152_s3 }
   0x5   :  { %3180 = sst [smem:[#allocation45_spill]] %s3153_s4 }
   0x6   :  { %3181 = sst [smem:[#allocation46_spill]] %s3154_s5 }
   0x7   :  { %3182 = sst [smem:[#allocation47_spill]] %s3155_s6 }
   0x8   :  { %3183 = sst [smem:[#allocation48_spill]] %s3163_s14 }
   0x9   :  { %19 = vsyncpa [#allocation6], 0 }
   0xa   :  { %21 = vsyncpa [#allocation6 + $0x1], 0 }
   0xb   :  { %22 = vsyncpa [#allocation9], 0 }
   0xc   :  { %24 = vsyncpa [#allocation9 + $0x1], 0 }
   0xd   :  { %25 = vsyncpa [#allocation12], 0 }
   0xe   :  { %26 = vsyncpa [#allocation15], 0 }
   0xf   :  { %27 = vsyncpa [#allocation18], 0 }
  0x10   :  { %28 = vsyncpa [#allocation21], 0 }
  0x11   :  { %29 = vsyncpa [#allocation24], 0 }
  0x12   :  { %30 = vsyncpa [#allocation27], 0 }
  0x13   :  { %31 = vsyncpa [#allocation7], 0 }
  0x14   :  { %33 = vsyncpa [#allocation7 + $0x1], 0  ;;  %s2551_s29 = smov 0   ;;  %s2553_s30 = smov 0  }
  0x15   :  { %s2555_s15 = smov 0   ;;  %s2557_s16 = smov 0  }
  0x16 LB: > { %s2442_s17 = smov [#allocation10]   ;;  %s2572_s19 = sadd.s32 4294967295, %s2432_s16   ;;  %s2432_s16 = sphi %s2557_s16, %s3231_s16   ;;  %s2428_s15 = sphi %s2555_s15, %s3230_s15   ;;  %s2424_s30 = sphi %s2553_s30, %s3229_s30   ;;  %s2420_s29 = sphi %s2551_s29, %s3228_s29  }
  0x17   : > { %s387_s18 = sshll.u32 %s2442_s17, 4  ;;  %3184 = sst [smem:[#allocation39_spill]] %s2572_s19  ;;  %s2577_s18 = int_to_ptr.vmem [resolvable:$true] %s387_s18 }
  0x18   : > { %p1558_p0 = scmp.ge.s32.totalorder %s2432_s16, 1  ;;  %p3171_p1 = scmp.eq.s32.totalorder %s2572_s19, 0 }
  0x19   : > { %p374_p2 = scmp.lt.s32.totalorder %s2432_s16, 3  ;;  %s2443_s21 = smov [#allocation11]  }
  0x1a   : > { %s398_s22 = sshll.u32 %s2443_s21, 4  ;;  %s2444_s23 = smov [#allocation14]   ;;  %s2586_s22 = int_to_ptr.vmem [resolvable:$true] %s398_s22 }
  0x1b   : > { %p2579_p3 = pnand %p1558_p0, %p374_p2  ;;  %s420_s24 = sshll.u32 %s2444_s23, 4  ;;  %s2594_s24 = int_to_ptr.vmem [resolvable:$true] %s420_s24 }
  0x1c   : > { %s2445_s26 = smov [#allocation17]   ;;  %s3188_s2 = sld [smem:[#allocation43_spill]] }
  0x1d   : > { %s3185_s20 = scalar_select %p2579_p3, 1, 0 }
  0x1e   : > { %p1769_p5 = pneg %p2579_p3  ;;  %s2596_s27 = sshll.u32 %s2445_s26, 4  ;;  %s445_s27 = int_to_ptr.vmem [resolvable:$true] %s2596_s27 }
  0x1f   : > { %3186 = sst [smem:[#allocation40_spill]] %s3185_s20 }
  0x20   : > { %p2590_p6 = pnand %p1769_p5, %p3171_p1 }
  0x22   : > { %s1930_s14 = scalar_lea.hbm %s3188_s2, 16  ;;  %p2606_p8 = pneg %p2590_p6 }
  0x23   : > { %p1931_p7 = scmp.ne.s32.totalorder %s3188_s2, %s1930_s14  ;;  %p1937_p11 = scmp.lt.u32.totalorder %s1930_s14, %s3188_s2 }
  0x25   : > { %p1933_p9 = pnand %p2606_p8, %p1931_p7 }
  0x27   : > { %p1934_p10 = pneg %p1933_p9 }
  0x29   : > { %p1939_p12 = pnand %p1937_p11, %p1934_p10 }
  0x2b   : > { %1942 = shalt.err (!%p1939_p12)
}
  0x2c   : > { %s1943_s20 = scalar_lea.vmem %s2577_s18, 16  ;;  %s1950_s28 = scalar_lea.vmem %s2577_s18, 32 }
  0x2d   : > { %p1944_p13 = scmp.ne.s32.totalorder %s2577_s18, %s1943_s20  ;;  %p1951_p5 = scmp.lt.s32.totalorder %s2577_s18, %s2577_s18 }
  0x2e   : > { %p1952_p7 = scmp.lt.s32.totalorder %s1950_s28, %s1943_s20 }
  0x2f   : > { %p1946_p0 = pnand %p1944_p13, %p2606_p8 }
  0x30   : > { %p1953_p9 = por %p1952_p7, %p1951_p5 }
  0x31   : > { %p1947_p2 = pneg %p1946_p0 }
  0x33   : > { %p1954_p4 = pnand %p1953_p9, %p1947_p2 }
  0x35   : > { %1957 = shalt.err (!%p1954_p4)
}
  0x36   : > { %1772 = dma.hbm_to_vmem [thread:$0]  (!%p2590_p6), %s3188_s2, 16, %s2577_s18, [#allocation9]  }
  0x37   : > { %s3190_s3 = sld [smem:[#allocation44_spill]] }
  0x3d   : > { %s1958_s26 = scalar_lea.hbm %s3190_s3, 16 }
  0x3e   : > { %p1959_p10 = scmp.ne.s32.totalorder %s3190_s3, %s1958_s26  ;;  %p1965_p4 = scmp.lt.u32.totalorder %s1958_s26, %s3190_s3 }
  0x40   : > { %p1961_p11 = pnand %p1959_p10, %p2606_p8 }
  0x42   : > { %p1962_p12 = pneg %p1961_p11 }
  0x44   : > { %p1967_p13 = pnand %p1965_p4, %p1962_p12 }
  0x46   : > { %1970 = shalt.err (!%p1967_p13)
}
  0x47   : > { %s1971_s18 = scalar_lea.vmem %s2586_s22, 16  ;;  %s1978_s0 = scalar_lea.vmem %s2586_s22, 32 }
  0x48   : > { %p1972_p0 = scmp.ne.s32.totalorder %s2586_s22, %s1971_s18  ;;  %p1979_p7 = scmp.lt.s32.totalorder %s2586_s22, %s2586_s22 }
  0x49   : > { %p1980_p9 = scmp.lt.s32.totalorder %s1978_s0, %s1971_s18 }
  0x4a   : > { %p1974_p2 = pnand %p1972_p0, %p2606_p8 }
  0x4b   : > { %p1981_p10 = por %p1980_p9, %p1979_p7 }
  0x4c   : > { %p1975_p5 = pneg %p1974_p2 }
  0x4e   : > { %p1982_p11 = pnand %p1981_p10, %p1975_p5 }
  0x50   : > { %1985 = shalt.err (!%p1982_p11)
}
  0x51   : > { %1775 = dma.hbm_to_vmem [thread:$0]  (!%p2590_p6), %s3190_s3, 16, %s2586_s22, [#allocation12]  }
  0x52   : > { %s3191_s5 = sld [smem:[#allocation46_spill]] }
  0x58   : > { %s1986_s21 = scalar_lea.hbm %s3191_s5, 16 }
  0x59   : > { %p1987_p12 = scmp.ne.s32.totalorder %s3191_s5, %s1986_s21  ;;  %p1993_p0 = scmp.lt.u32.totalorder %s1986_s21, %s3191_s5 }
  0x5b   : > { %p1989_p4 = pnand %p1987_p12, %p2606_p8 }
  0x5d   : > { %p1990_p13 = pneg %p1989_p4 }
  0x5f   : > { %p1995_p2 = pnand %p1993_p0, %p1990_p13 }
  0x61   : > { %1998 = shalt.err (!%p1995_p2)
}
  0x62   : > { %s1999_s22 = scalar_lea.vmem %s2594_s24, 16  ;;  %s2006_s0 = scalar_lea.vmem %s2594_s24, 32 }
  0x63   : > { %p2000_p5 = scmp.ne.s32.totalorder %s2594_s24, %s1999_s22  ;;  %p2007_p10 = scmp.lt.s32.totalorder %s2594_s24, %s2594_s24 }
  0x64   : > { %p2008_p11 = scmp.lt.s32.totalorder %s2006_s0, %s1999_s22 }
  0x65   : > { %p2002_p7 = pnand %p2000_p5, %p2606_p8 }
  0x66   : > { %p2009_p12 = por %p2008_p11, %p2007_p10 }
  0x67   : > { %p2003_p9 = pneg %p2002_p7 }
  0x69   : > { %p2010_p4 = pnand %p2009_p12, %p2003_p9 }
  0x6b   : > { %2013 = shalt.err (!%p2010_p4)
}
  0x6c   : > { %1781 = dma.hbm_to_vmem [thread:$0]  (!%p2590_p6), %s3191_s5, 16, %s2594_s24, [#allocation15]  }
  0x6d   : > { %s2446_s14 = smov [#allocation20]   ;;  %s2014_s20 = scalar_lea.hbm %s3156_s7, 16 }
  0x6e   : > { %s468_s17 = sshll.u32 %s2446_s14, 4  ;;  %p2015_p13 = scmp.ne.s32.totalorder %s3156_s7, %s2014_s20  ;;  %s469_s17 = int_to_ptr.vmem [resolvable:$true] %s468_s17 }
  0x6f   : > { %p2021_p5 = scmp.lt.u32.totalorder %s2014_s20, %s3156_s7 }
  0x70   : > { %p2017_p0 = pnand %p2015_p13, %p2606_p8 }
  0x72   : > { %p2018_p2 = pneg %p2017_p0 }
  0x74   : > { %p2023_p7 = pnand %p2021_p5, %p2018_p2 }
  0x76   : > { %2026 = shalt.err (!%p2023_p7)
}
  0x77   : > { %s2027_s24 = scalar_lea.vmem %s445_s27, 16  ;;  %s2034_s19 = scalar_lea.vmem %s445_s27, 32 }
  0x78   : > { %p2028_p9 = scmp.ne.s32.totalorder %s445_s27, %s2027_s24  ;;  %p2035_p12 = scmp.lt.s32.totalorder %s445_s27, %s445_s27 }
  0x79   : > { %p2036_p4 = scmp.lt.s32.totalorder %s2034_s19, %s2027_s24 }
  0x7a   : > { %p2030_p10 = pnand %p2028_p9, %p2606_p8 }
  0x7b   : > { %p2037_p1 = por %p2036_p4, %p2035_p12 }
  0x7c   : > { %p2031_p11 = pneg %p2030_p10 }
  0x7e   : > { %p2038_p3 = pnand %p2037_p1, %p2031_p11 }
  0x80   : > { %2041 = shalt.err (!%p2038_p3)
}
  0x81   : > { %1787 = dma.hbm_to_vmem [thread:$0]  (!%p2590_p6), %s3156_s7, 16, %s445_s27, [#allocation18]  }
  0x82   : > { %s2042_s20 = scalar_lea.hbm %s3158_s9, 16 }
  0x83   : > { %p2043_p13 = scmp.ne.s32.totalorder %s3158_s9, %s2042_s20  ;;  %p2049_p3 = scmp.lt.u32.totalorder %s2042_s20, %s3158_s9 }
  0x85   : > { %p2045_p0 = pnand %p2043_p13, %p2606_p8 }
  0x87   : > { %p2046_p1 = pneg %p2045_p0 }
  0x89   : > { %p2051_p2 = pnand %p2049_p3, %p2046_p1 }
  0x8b   : > { %2054 = shalt.err (!%p2051_p2)
}
  0x8c   : > { %s2055_s24 = scalar_lea.vmem %s469_s17, 16  ;;  %s2062_s27 = scalar_lea.vmem %s469_s17, 32 }
  0x8d   : > { %p2056_p5 = scmp.ne.s32.totalorder %s469_s17, %s2055_s24  ;;  %p2063_p10 = scmp.lt.s32.totalorder %s469_s17, %s469_s17 }
  0x8e   : > { %p2064_p11 = scmp.lt.s32.totalorder %s2062_s27, %s2055_s24 }
  0x8f   : > { %p2058_p7 = pnand %p2056_p5, %p2606_p8 }
  0x90   : > { %p2065_p12 = por %p2064_p11, %p2063_p10 }
  0x91   : > { %p2059_p9 = pneg %p2058_p7 }
  0x93   : > { %p2066_p4 = pnand %p2065_p12, %p2059_p9 }
  0x95   : > { %2069 = shalt.err (!%p2066_p4)
}
  0x96   : > { %1793 = dma.hbm_to_vmem [thread:$0]  (!%p2590_p6), %s3158_s9, 16, %s469_s17, [#allocation21]  }
  0x97   : > { %s2447_s14 = smov [#allocation23]   ;;  %s2448_s26 = smov [#allocation13]  }
  0x98   : > { %s492_s21 = sshll.u32 %s2447_s14, 4  ;;  %s409_s20 = sshll.u32 %s2448_s26, 4  ;;  %s493_s21 = int_to_ptr.vmem [resolvable:$true] %s492_s21  ;;  %s410_s20 = int_to_ptr.vmem [resolvable:$true] %s409_s20 }
  0x99   : > { %s2070_s22 = scalar_lea.hbm %s3160_s11, 16 }
  0x9a   : > { %p2071_p13 = scmp.ne.s32.totalorder %s3160_s11, %s2070_s22  ;;  %p2077_p3 = scmp.lt.u32.totalorder %s2070_s22, %s3160_s11 }
  0x9c   : > { %p2073_p0 = pnand %p2071_p13, %p2606_p8 }
  0x9e   : > { %p2074_p1 = pneg %p2073_p0 }
  0xa0   : > { %p2079_p2 = pnand %p2077_p3, %p2074_p1 }
  0xa2   : > { %2082 = shalt.err (!%p2079_p2)
}
  0xa3   : > { %s2083_s17 = scalar_lea.vmem %s493_s21, 16  ;;  %s2090_s1 = scalar_lea.vmem %s493_s21, 32 }
  0xa4   : > { %p2084_p5 = scmp.ne.s32.totalorder %s493_s21, %s2083_s17  ;;  %p2091_p10 = scmp.lt.s32.totalorder %s493_s21, %s493_s21 }
  0xa5   : > { %p2092_p11 = scmp.lt.s32.totalorder %s2090_s1, %s2083_s17 }
  0xa6   : > { %p2086_p7 = pnand %p2084_p5, %p2606_p8 }
  0xa7   : > { %p2093_p12 = por %p2092_p11, %p2091_p10 }
  0xa8   : > { %p2087_p9 = pneg %p2086_p7 }
  0xaa   : > { %p2094_p4 = pnand %p2093_p12, %p2087_p9 }
  0xac   : > { %2097 = shalt.err (!%p2094_p4)
}
  0xad   : > { %1799 = dma.hbm_to_vmem [thread:$0]  (!%p2590_p6), %s3160_s11, 16, %s493_s21, [#allocation24]  }
  0xae   : > { %s3192_s4 = sld [smem:[#allocation45_spill]] }
  0xb4   : > { %s2098_s22 = scalar_lea.hbm %s3192_s4, 16 }
  0xb5   : > { %p2099_p13 = scmp.ne.s32.totalorder %s3192_s4, %s2098_s22  ;;  %p2105_p3 = scmp.lt.u32.totalorder %s2098_s22, %s3192_s4 }
  0xb7   : > { %p2101_p0 = pnand %p2099_p13, %p2606_p8 }
  0xb9   : > { %p2102_p1 = pneg %p2101_p0 }
  0xbb   : > { %p2107_p2 = pnand %p2105_p3, %p2102_p1 }
  0xbd   : > { %2110 = shalt.err (!%p2107_p2)
}
  0xbe   : > { %s2111_s17 = scalar_lea.vmem %s410_s20, 16  ;;  %s2118_s21 = scalar_lea.vmem %s410_s20, 32 }
  0xbf   : > { %p2112_p5 = scmp.ne.s32.totalorder %s410_s20, %s2111_s17  ;;  %p2119_p10 = scmp.lt.s32.totalorder %s410_s20, %s410_s20 }
  0xc0   : > { %p2120_p11 = scmp.lt.s32.totalorder %s2118_s21, %s2111_s17 }
  0xc1   : > { %p2114_p7 = pnand %p2112_p5, %p2606_p8 }
  0xc2   : > { %p2121_p12 = por %p2120_p11, %p2119_p10 }
  0xc3   : > { %p2115_p9 = pneg %p2114_p7 }
  0xc5   : > { %p2122_p4 = pnand %p2121_p12, %p2115_p9 }
  0xc7   : > { %2125 = shalt.err (!%p2122_p4)
}
  0xc8   : > { %1778 = dma.hbm_to_vmem [thread:$0]  (!%p2590_p6), %s3192_s4, 16, %s410_s20, [#allocation12]  }
  0xc9   : > { %s2449_s26 = smov [#allocation16]   ;;  %s3193_s6 = sld [smem:[#allocation47_spill]] }
  0xca   : > { %s430_s28 = sshll.u32 %s2449_s26, 4  ;;  %s431_s28 = int_to_ptr.vmem [resolvable:$true] %s430_s28 }
  0xcf   : > { %s2126_s0 = scalar_lea.hbm %s3193_s6, 512 }
  0xd0   : > { %p2127_p13 = scmp.ne.s32.totalorder %s3193_s6, %s2126_s0  ;;  %p2133_p3 = scmp.lt.u32.totalorder %s2126_s0, %s3193_s6 }
  0xd2   : > { %p2129_p0 = pnand %p2127_p13, %p2606_p8 }
  0xd4   : > { %p2130_p1 = pneg %p2129_p0 }
  0xd6   : > { %p2135_p2 = pnand %p2133_p3, %p2130_p1 }
  0xd8   : > { %2138 = shalt.err (!%p2135_p2)
}
  0xd9   : > { %s2139_s20 = scalar_lea.vmem %s431_s28, 512  ;;  %p2147_p10 = scmp.lt.s32.totalorder %s431_s28, %s431_s28 }
  0xda   : > { %p2140_p5 = scmp.ne.s32.totalorder %s431_s28, %s2139_s20  ;;  %p2148_p11 = scmp.lt.s32.totalorder %s2139_s20, %s2139_s20 }
  0xdc   : > { %p2142_p7 = pnand %p2140_p5, %p2606_p8  ;;  %p2149_p12 = por %p2148_p11, %p2147_p10 }
  0xde   : > { %p2143_p9 = pneg %p2142_p7 }
  0xe0   : > { %p2150_p4 = pnand %p2149_p12, %p2143_p9 }
  0xe2   : > { %2153 = shalt.err (!%p2150_p4)
}
  0xe3   : > { %s2450_s21 = smov 128   ;;  %s2451_s1 = smov 8  }
  0xe4   : > { %1784 = dma.hbm_to_vmem [thread:$0]  (!%p2590_p6), %s3193_s6, 512, %s431_s28, [#allocation15], %s2450_s21, %s2450_s21, %s2451_s1  }
  0xe5   : > { %s2452_s18 = smov [#allocation19]   ;;  %s2453_s0 = smov [#allocation22]  }
  0xe6   : > { %s454_s22 = sshll.u32 %s2452_s18, 4  ;;  %s478_s24 = sshll.u32 %s2453_s0, 4  ;;  %s455_s22 = int_to_ptr.vmem [resolvable:$true] %s454_s22  ;;  %s2770_s24 = int_to_ptr.vmem [resolvable:$true] %s478_s24 }
  0xe7   : > { %s2154_s17 = scalar_lea.hbm %s3157_s8, 512 }
  0xe8   : > { %p2155_p13 = scmp.ne.s32.totalorder %s3157_s8, %s2154_s17  ;;  %p2161_p3 = scmp.lt.u32.totalorder %s2154_s17, %s3157_s8 }
  0xea   : > { %p2157_p0 = pnand %p2155_p13, %p2606_p8 }
  0xec   : > { %p2158_p1 = pneg %p2157_p0 }
  0xee   : > { %p2163_p2 = pnand %p2161_p3, %p2158_p1 }
  0xf0   : > { %2166 = shalt.err (!%p2163_p2)
}
  0xf1   : > { %s2167_s26 = scalar_lea.vmem %s455_s22, 512  ;;  %p2175_p10 = scmp.lt.s32.totalorder %s455_s22, %s455_s22 }
  0xf2   : > { %p2168_p5 = scmp.ne.s32.totalorder %s455_s22, %s2167_s26  ;;  %p2176_p11 = scmp.lt.s32.totalorder %s2167_s26, %s2167_s26 }
  0xf4   : > { %p2170_p7 = pnand %p2168_p5, %p2606_p8  ;;  %p2177_p12 = por %p2176_p11, %p2175_p10 }
  0xf6   : > { %p2171_p9 = pneg %p2170_p7 }
  0xf8   : > { %p2178_p4 = pnand %p2177_p12, %p2171_p9 }
  0xfa   : > { %2181 = shalt.err (!%p2178_p4)
}
  0xfb   : > { %1790 = dma.hbm_to_vmem [thread:$0]  (!%p2590_p6), %s3157_s8, 512, %s455_s22, [#allocation18], %s2450_s21, %s2450_s21, %s2451_s1  }
  0xfc   : > { %s2182_s19 = scalar_lea.hbm %s3159_s10, 512 }
  0xfd   : > { %p2183_p13 = scmp.ne.s32.totalorder %s3159_s10, %s2182_s19  ;;  %p2189_p3 = scmp.lt.u32.totalorder %s2182_s19, %s3159_s10 }
  0xff   : > { %p2185_p0 = pnand %p2183_p13, %p2606_p8 }
 0x101   : > { %p2186_p1 = pneg %p2185_p0 }
 0x103   : > { %p2191_p2 = pnand %p2189_p3, %p2186_p1 }
 0x105   : > { %2194 = shalt.err (!%p2191_p2)
}
 0x106   : > { %s2195_s22 = scalar_lea.vmem %s2770_s24, 512  ;;  %p2203_p10 = scmp.lt.s32.totalorder %s2770_s24, %s2770_s24 }
 0x107   : > { %p2196_p5 = scmp.ne.s32.totalorder %s2770_s24, %s2195_s22  ;;  %p2204_p11 = scmp.lt.s32.totalorder %s2195_s22, %s2195_s22 }
 0x109   : > { %p2198_p7 = pnand %p2196_p5, %p2606_p8  ;;  %p2205_p12 = por %p2204_p11, %p2203_p10 }
 0x10b   : > { %p2199_p9 = pneg %p2198_p7 }
 0x10d   : > { %p2206_p4 = pnand %p2205_p12, %p2199_p9 }
 0x10f   : > { %2209 = shalt.err (!%p2206_p4)
}
 0x110   : > { %1796 = dma.hbm_to_vmem [thread:$0]  (!%p2590_p6), %s3159_s10, 512, %s2770_s24, [#allocation21], %s2450_s21, %s2450_s21, %s2451_s1  }
 0x111   : > { %s2454_s18 = smov [#allocation25]   ;;  %s2455_s27 = smov [#allocation26]  }
 0x112   : > { %s502_s0 = sshll.u32 %s2454_s18, 4  ;;  %s516_s19 = sshll.u32 %s2455_s27, 4  ;;  %s503_s0 = int_to_ptr.vmem [resolvable:$true] %s502_s0  ;;  %s2819_s19 = int_to_ptr.vmem [resolvable:$true] %s516_s19 }
 0x113   : > { %s2210_s14 = scalar_lea.hbm %s3161_s12, 1024 }
 0x114   : > { %p2211_p13 = scmp.ne.s32.totalorder %s3161_s12, %s2210_s14  ;;  %p2217_p3 = scmp.lt.u32.totalorder %s2210_s14, %s3161_s12 }
 0x116   : > { %p2213_p0 = pnand %p2211_p13, %p2606_p8 }
 0x118   : > { %p2214_p1 = pneg %p2213_p0 }
 0x11a   : > { %p2219_p2 = pnand %p2217_p3, %p2214_p1 }
 0x11c   : > { %2222 = shalt.err (!%p2219_p2)
}
 0x11d   : > { %s2223_s2 = scalar_lea.vmem %s503_s0, 1024  ;;  %p2231_p10 = scmp.lt.s32.totalorder %s503_s0, %s503_s0 }
 0x11e   : > { %p2224_p5 = scmp.ne.s32.totalorder %s503_s0, %s2223_s2  ;;  %p2232_p11 = scmp.lt.s32.totalorder %s2223_s2, %s2223_s2 }
 0x120   : > { %p2226_p7 = pnand %p2224_p5, %p2606_p8  ;;  %p2233_p12 = por %p2232_p11, %p2231_p10 }
 0x122   : > { %p2227_p9 = pneg %p2226_p7 }
 0x124   : > { %p2234_p4 = pnand %p2233_p12, %p2227_p9 }
 0x126   : > { %2237 = shalt.err (!%p2234_p4)
}
 0x127   : > { %1802 = dma.hbm_to_vmem [thread:$0]  (!%p2590_p6), %s3161_s12, 1024, %s503_s0, [#allocation24], %s2450_s21, %s2450_s21, %s2451_s1  }
 0x128   : > { %s2238_s14 = scalar_lea.hbm %s3162_s13, 16 }
 0x129   : > { %p2239_p13 = scmp.ne.s32.totalorder %s3162_s13, %s2238_s14  ;;  %p2245_p3 = scmp.lt.u32.totalorder %s2238_s14, %s3162_s13 }
 0x12b   : > { %p2241_p0 = pnand %p2239_p13, %p2606_p8 }
 0x12d   : > { %p2242_p1 = pneg %p2241_p0 }
 0x12f   : > { %p2247_p2 = pnand %p2245_p3, %p2242_p1 }
 0x131   : > { %2250 = shalt.err (!%p2247_p2)
}
 0x132   : > { %s2251_s21 = scalar_lea.vmem %s2819_s19, 16  ;;  %s2258_s1 = scalar_lea.vmem %s2819_s19, 32 }
 0x133   : > { %p2252_p5 = scmp.ne.s32.totalorder %s2819_s19, %s2251_s21  ;;  %p2259_p10 = scmp.lt.s32.totalorder %s2819_s19, %s2819_s19 }
 0x134   : > { %p2260_p11 = scmp.lt.s32.totalorder %s2258_s1, %s2251_s21 }
 0x135   : > { %p2254_p7 = pnand %p2252_p5, %p2606_p8 }
 0x136   : > { %p2261_p12 = por %p2260_p11, %p2259_p10 }
 0x137   : > { %p2255_p9 = pneg %p2254_p7 }
 0x139   : > { %p2262_p4 = pnand %p2261_p12, %p2255_p9 }
 0x13b   : > { %2265 = shalt.err (!%p2262_p4)
}
 0x13c   : > { %s3194_s23 = sld [smem:[#allocation39_spill]]  ;;  %s1557_s25 = sadd.s32 4294967294, %s2432_s16  }
 0x13d   : > { %1805 = dma.hbm_to_vmem [thread:$0]  (!%p2590_p6), %s3162_s13, 16, %s2819_s19, [#allocation27]  }
 0x13e   : > { %s2868_s18 = sadd.s32 1, %s2432_s16   ;;  %s46_s17 = sadd.s32 1, %s2428_s15 }
 0x13f   : > { %s43_s27 = ssub.s32 %s2432_s16, %s2868_s18  ;;  %p53_p13 = scmp.ne.s32.totalorder %s2428_s15, %s2424_s30 }
 0x140   : > { %p44_p8 = scmp.eq.s32.totalorder %s43_s27, 0  ;;  %p54_p0 = scmp.eq.s32.totalorder %s2432_s16, 0 }
 0x141   : > { %p59_p1 = scmp.ne.s32.totalorder %s2424_s30, %s2420_s29  ;;  %p367_p7 = scmp.eq.s32.totalorder %s1557_s25, 1 }
 0x142   : > { %s2879_s20 = scalar_select %p44_p8, %s2428_s15, %s46_s17  }
 0x143   : > { %p2881_p3 = por %p54_p0, %p53_p13  ;;  %p3196_p2 = scmp.eq.s32.totalorder %s3194_s23, 0 }
 0x144   : > { %p361_p5 = scmp.eq.s32.totalorder %s3194_s23, 1  ;;  %p1829_p9 = scmp.lt.s32.totalorder %s2432_s16, 2 }
 0x145   : > { %p2887_p6 = por %p3196_p2, %p59_p1  ;;  %s2894_s28 = sand.u32 1, %s2428_s15  }
 0x146   : > { %p2896_p10 = por %p361_p5, %p53_p13  ;;  %p2900_p11 = por %p367_p7, %p59_p1 }
 0x147   : > { %s3197_s19 = scalar_select %p2887_p6, 1, 0 }
 0x148   : > { %s3198_s22 = scalar_select %p2896_p10, 1, 0 }
 0x149   : > { %s3199_s26 = scalar_select %p2900_p11, 1, 0 }
 0x14a   : > { %s1572_s24 = sshll.u32 %s2894_s28, 3  ;;  %s1573_s21 = sshll.u32 %s2432_s16, 7 }
 0x14b   : > { %s3200_s2 = sld [smem:[#allocation41_spill]]  ;;  %s531_s25 = scalar_lea.vmem [#allocation5], %s1572_s24 }
 0x14c   : > { %s538_s27 = sshll.u32 %s531_s25, 4  ;;  %p2915_p12 = pnand %p1829_p9, %p2881_p3  ;;  %s2911_s27 = int_to_ptr.vmem [resolvable:$true] %s538_s27 }
 0x14d   : > { %s528_s4 = scalar_lea.sflag [#allocation6], %s2894_s28 }
 0x14e   : > { %p2268_p8 = pneg %p2915_p12 }
 0x151   : > { %s2909_s23 = scalar_lea.hbm %s3200_s2, %s1573_s21  ;;  %s2271_s14 = scalar_lea.hbm %s3200_s2, 256 }
 0x152   : > { %s2266_s1 = scalar_lea.hbm %s2909_s23, 128  ;;  %p2272_p1 = scmp.lt.u32.totalorder %s2909_s23, %s3200_s2 }
 0x153   : > { %p2267_p4 = scmp.ne.s32.totalorder %s2909_s23, %s2266_s1  ;;  %p2273_p3 = scmp.lt.u32.totalorder %s2271_s14, %s2266_s1 }
 0x154   : > { %p2275_p5 = scmp.lt.u32.totalorder %s2266_s1, %s2909_s23 }
 0x155   : > { %p2269_p13 = pnand %p2268_p8, %p2267_p4  ;;  %p2274_p2 = por %p2273_p3, %p2272_p1 }
 0x157   : > { %p2270_p0 = pneg %p2269_p13  ;;  %p2276_p7 = por %p2275_p5, %p2274_p2 }
 0x159   : > { %p2277_p9 = pnand %p2276_p7, %p2270_p0 }
 0x15b   : > { %2280 = shalt.err (!%p2277_p9)
}
 0x15c   : > { %s2281_s3 = scalar_lea.vmem %s2911_s27, 128  ;;  %s2456_s24 = smov [#allocation5]  }
 0x15d   : > { %p2282_p4 = scmp.ne.s32.totalorder %s2911_s27, %s2281_s3  ;;  %s2286_s21 = sshll.u32 %s2456_s24, 4  ;;  %s2287_s21 = int_to_ptr.vmem [resolvable:$false] %s2286_s21 }
 0x15e   : > { %s2288_s0 = scalar_lea.vmem %s2287_s21, 256  ;;  %p2289_p10 = scmp.lt.s32.totalorder %s2911_s27, %s2287_s21 }
 0x15f   : > { %p2284_p13 = pnand %p2282_p4, %p2268_p8  ;;  %p2290_p1 = scmp.lt.s32.totalorder %s2288_s0, %s2281_s3 }
 0x161   : > { %p2285_p11 = pneg %p2284_p13  ;;  %p2291_p3 = por %p2290_p1, %p2289_p10 }
 0x163   : > { %p2292_p2 = pnand %p2291_p3, %p2285_p11 }
 0x165   : > { %2295 = shalt.err (!%p2292_p2)
}
 0x166   : > { %1809 = dma.hbm_to_vmem [thread:$0]  (!%p2915_p12), %s2909_s23, 128, %s2911_s27, %s528_s4  }
 0x167   : > { %s1574_s1 = sshll.u32 %s2432_s16, 4  ;;  %s548_s14 = scalar_lea.vmem [#allocation8], %s2894_s28 }
 0x168   : > { %s555_s25 = sshll.u32 %s548_s14, 4  ;;  %s3202_s5 = sld [smem:[#allocation42_spill]]  ;;  %s556_s25 = int_to_ptr.vmem [resolvable:$true] %s555_s25 }
 0x169   : > { %s3203_s3 = sand.u32 1, %s2432_s16  }
 0x16a   : > { %s546_s0 = scalar_lea.sflag [#allocation9], %s3203_s3 }
 0x16e   : > { %s2951_s21 = scalar_lea.hbm %s3202_s5, %s1574_s1  ;;  %s2301_s23 = scalar_lea.hbm %s3202_s5, 32 }
 0x16f   : > { %s2296_s6 = scalar_lea.hbm %s2951_s21, 16  ;;  %p2302_p5 = scmp.lt.u32.totalorder %s2951_s21, %s3202_s5 }
 0x170   : > { %p2297_p10 = scmp.ne.s32.totalorder %s2951_s21, %s2296_s6  ;;  %p2303_p7 = scmp.lt.u32.totalorder %s2301_s23, %s2296_s6 }
 0x171   : > { %p2305_p4 = scmp.lt.u32.totalorder %s2296_s6, %s2951_s21 }
 0x172   : > { %p2299_p11 = pnand %p2297_p10, %p2268_p8  ;;  %p2304_p9 = por %p2303_p7, %p2302_p5 }
 0x174   : > { %p2300_p0 = pneg %p2299_p11  ;;  %p2306_p13 = por %p2305_p4, %p2304_p9 }
 0x176   : > { %p2307_p1 = pnand %p2306_p13, %p2300_p0 }
 0x178   : > { %2310 = shalt.err (!%p2307_p1)
}
 0x179   : > { %s2311_s1 = scalar_lea.vmem %s556_s25, 16  ;;  %s2457_s14 = smov [#allocation8]  }
 0x17a   : > { %p2312_p3 = scmp.ne.s32.totalorder %s556_s25, %s2311_s1  ;;  %s2316_s24 = sshll.u32 %s2457_s14, 4  ;;  %s2317_s24 = int_to_ptr.vmem [resolvable:$false] %s2316_s24 }
 0x17b   : > { %s2318_s3 = scalar_lea.vmem %s2317_s24, 32  ;;  %p2319_p11 = scmp.lt.s32.totalorder %s556_s25, %s2317_s24 }
 0x17c   : > { %p2314_p2 = pnand %p2312_p3, %p2268_p8  ;;  %p2320_p6 = scmp.lt.s32.totalorder %s2318_s3, %s2311_s1 }
 0x17e   : > { %p2315_p10 = pneg %p2314_p2  ;;  %p2321_p5 = por %p2320_p6, %p2319_p11 }
 0x180   : > { %p2322_p7 = pnand %p2321_p5, %p2315_p10 }
 0x182   : > { %2325 = shalt.err (!%p2322_p7)
}
 0x183   : > { %1812 = dma.hbm_to_vmem [thread:$0]  (!%p2915_p12), %s2951_s21, 16, %s556_s25, %s546_s0  }
 0x184   : > { %s3204_s6 = sld [smem:[#allocation40_spill]] }
 0x18a   : > { %p3205_p0 = scmp.ne.s32.totalorder %s3204_s6, 0 }
 0x18b   : > { %s2977_s4 = sand.u32 (!%p3205_p0), 1, %s2424_s30   ;;  %p3206_p6 = scmp.ne.s32.totalorder (!%p3205_p0), %s3197_s19, 0 }
 0x18c   : > { %564 = sbr.rel (%p3205_p0) target bundleno = 2835 (0xb13), region = 76  ;;  %s1576_s28 = sshll.u32 (!%p3205_p0), %s2977_s4, 3 }
 0x18d   : > { %s567_s23 = scalar_lea.sflag (!%p3205_p0), [#allocation6], %s2977_s4  ;;  %s570_s2 = scalar_lea.vmem (!%p3205_p0), [#allocation5], %s1576_s28 }
 0x193   : > { %2379 = dma.done.wait (%p3206_p6), %s567_s23, 128  }
 0x194   : > { %2381 = vsyncadd (%p3206_p6), %s567_s23, 4294967168  ;;  %s3207_s17 = sld [smem:[#allocation39_spill]]  ;;  %s578_s0 = scalar_lea.vmem [#allocation8], %s2977_s4 }
 0x19a   : > { %s575_s25 = sand.u32 1, %s3207_s17  }
 0x19b   : > { %s576_s21 = scalar_lea.sflag [#allocation9], %s575_s25 }
 0x19c   : > { %2383 = dma.done.wait (%p3206_p6), %s576_s21, 16  }
 0x19d   : > { %2385 = vsyncadd (%p3206_p6), %s576_s21, 4294967280  ;;  %p3208_p12 = scmp.eq.s32.totalorder %s3207_s17, 0 }
 0x19f   : > { %2387 = dma.done.wait (%p3208_p12), [#allocation9], 16   ;;  %p3209_p8 = pmov %p3208_p12 }
 0x1a1   : > { %2389 = vsyncadd (%p3209_p8), [#allocation9], 4294967280  ;;  %p3210_p9 = pmov %p3209_p8 }
 0x1a2   : > { %p3211_p4 = pmov %p3209_p8 }
 0x1a3   : > { %2391 = dma.done.wait (%p3210_p9), [#allocation12], 32  }
 0x1a4   : > { %2393 = vsyncadd (%p3211_p4), [#allocation12], 4294967264  ;;  %p3212_p13 = pmov %p3211_p4 }
 0x1a5   : > { %p3213_p1 = pmov %p3211_p4 }
 0x1a6   : > { %2395 = dma.done.wait (%p3212_p13), [#allocation15], 528  }
 0x1a7   : > { %2397 = vsyncadd (%p3213_p1), [#allocation15], 4294966768  ;;  %p3214_p3 = pmov %p3213_p1 }
 0x1a8   : > { %p3215_p2 = pmov %p3213_p1 }
 0x1a9   : > { %2399 = dma.done.wait (%p3214_p3), [#allocation18], 528  }
 0x1aa   : > { %2401 = vsyncadd (%p3215_p2), [#allocation18], 4294966768  ;;  %p3216_p10 = pmov %p3213_p1 }
 0x1ab   : > { %p3217_p11 = pmov %p3213_p1 }
 0x1ac   : > { %2403 = dma.done.wait (%p3216_p10), [#allocation21], 528  }
 0x1ad   : > { %2405 = vsyncadd (%p3217_p11), [#allocation21], 4294966768  ;;  %p3218_p5 = pmov %p3213_p1 }
 0x1ae   : > { %p3219_p7 = pmov %p3213_p1 }
 0x1af   : > { %2407 = dma.done.wait (%p3218_p5), [#allocation24], 1040  }
 0x1b0   : > { %2409 = vsyncadd (%p3219_p7), [#allocation24], 4294966256  ;;  %p3220_p0 = pmov %p3213_p1 }
 0x1b2   : > { %2411 = dma.done.wait (%p3220_p0), [#allocation27], 16   ;;  %p3221_p6 = pmov %p3220_p0 }
 0x1b3   : > { %vm680_vm0 = vcmask 261120   ;;  %v3021_v0 = vld [vmem:[%s578_s0] sm:$0x1]  ;;  %v710_v9 = vld [vmem:[#allocation16 + $0x8] sm:$0xff]  ;;  %v711_v10 = vld [vmem:[#allocation16 + $0x10] sm:$0xff]  ;;  %v2458_v11 = vmov 0.0|0.0  }
 0x1b4   : > { %2413 = vsyncadd (%p3221_p6), [#allocation27], 4294967280  ;;  %v3023_v1 = vld [vmem:[%s570_s2] sm:$0xff]  ;;  %vm677_vm1 = vcmp.gt.f32.partialorder %v3021_v0, 0.0  ;;  %1691 = vmatprep.subr.bf16.mxu0 %v2458_v11  ;;  %v712_v13 = vld [vmem:[#allocation16 + $0x18] sm:$0xff]  ;;  %vm2459_vm2 = vmmov 0  }
 0x1b5   : > { %v681_v2 = vsel %vm680_vm0, %v3023_v1, 0.0  ;;  %v709_v8 = vld [vmem:[#allocation16] sm:$0xff]  ;;  %v2460_v14 = vmov 0.0   ;;  %v1695_v15 = vpack.c.bf16 %v712_v13, %v711_v10  ;;  %v1590_v20 = vld [vmem:[#allocation10] ss:$0 sm:$0xff]  ;;  %vm794_vm3 = vcmask 64512  }
 0x1b6   : > { %682 = vadd.xlane.f32.xlu0 %v681_v2  ;;  %v1692_v12 = vpack.c.bf16 %v710_v9, %v709_v8  ;;  %1643 = vmatprep.mubr.msk.f32.mxu0 %vm2459_vm2, %v2460_v14  ;;  %v1591_v22 = vld [vmem:[#allocation11] ss:$0 sm:$0xff]  ;;  %v1592_v25 = vld [vmem:[#allocation17] ss:$0 sm:$0xff]  ;;  %s2461_s19 = smov 96   ;;  %s2462_s27 = smov 120  }
 0x1b7   : > { %s2463_s1 = smov 64   ;;  %s2464_s14 = smov 72   ;;  %v3051_v41 = vmov 0.0  }
 0x1b8   : > { %1693 = vmatpush3.bf16.msra.mxu0 %v1692_v12  ;;  %s2465_s24 = smov 88   ;;  %s2466_s3 = smov 56  }
 0x1b9   : > { %1694 = vmatprep.subr.bf16.mxu0 %v2458_v11  ;;  %s2467_s6 = smov 80   ;;  %s2468_s23 = smov 48  }
 0x1ba   : > { %s2469_s2 = smov 112   ;;  %s2470_s17 = smov 104  }
 0x1bb   : > { %s2471_s25 = smov 40   ;;  %s3049_s21 = scalar_lea.vmem [#allocation28], %s1576_s28 }
 0x1bc   : > { %1696 = vmatpush3.bf16.msra.mxu0 %v1695_v15  ;;  %s3053_s0 = smov 0  }
 0x243   : > { %v683_v3 = vpop.xlane.xlu0 %682 }
 0x244   : > { %v685_v4 = vmul.f32 0.03125, %v683_v3 }
 0x246   : > { %v686_v5 = vsub.f32 %v3023_v1, %v685_v4 }
 0x248   : > { %v687_v6 = vmul.f32 %v686_v5, %v686_v5 }
 0x24a   : > { %v688_v7 = vsel %vm680_vm0, %v687_v6, 0.0 }
 0x24b   : > { %689 = vadd.xlane.f32.xlu0 %v688_v7 }
 0x2d8   : > { %v690_v16 = vpop.xlane.xlu0 %689 }
 0x2d9   : > { %v691_v17 = vmul.f32 0.03125, %v690_v16 }
 0x2db   : > { %v692_v18 = vadd.f32 1e-12, %v691_v17 }
 0x2dd   : > { %1922 = vrsqrt.f32 %v692_v18 }
 0x2e7   : > { %v1923_v19 = vpop.eup %1922 }
 0x2e8   : > { %v694_v21 = vmul.f32 %v1923_v19, %v686_v5 }
 0x2ea   : > { %v701_v23 = vmul.f32 %v1590_v20, %v694_v21 }
 0x2ec   : > { %v708_v24 = vadd.f32 %v1591_v22, %v701_v23 }
 0x2ee   : > { %1644 = vmatmul.mubr.msk.f32.vlgmr.msra.gmra.mrb[0].mxu0 %vm680_vm0, %v708_v24 }
 0x3c1   : > { %v789_v26 = vpop.f32.mrb[0].mxu0 }
 0x3c2   : > { %v790_v27 = vadd.f32 %v1592_v25, %v789_v26  ;;  %v1645_v28 = vpop.f32.mrb[1].mxu0 }
 0x3c4   : > { %797 = vrot.lane.b32.xlu1 %v790_v27, %s2461_s19  ;;  %v793_v29 = vmul.f32 0.35355338, %v790_v27 }
 0x3c6   : > { %806 = vrot.lane.b32.xlu0 %v793_v29, %s2462_s27  ;;  %795 = vst.msk [vmem:[#allocation2] sm:$0xff] %vm794_vm3, %v793_v29 }
 0x3c8   : > { %801 = vrot.lane.b32.xlu1 %v790_v27, %s2463_s1 }
 0x3ca   : > { %841 = vrot.lane.b32.xlu0 %v790_v27, %s2464_s14 }
 0x3cc   : > { %811 = vrot.lane.b32.xlu1 %v790_v27, %s2465_s24 }
 0x3d0   : > { %816 = vrot.lane.b32.xlu1 %v790_v27, %s2466_s3 }
 0x3d4   : > { %826 = vrot.lane.b32.xlu1 %v790_v27, %s2467_s6 }
 0x3d8   : > { %831 = vrot.lane.b32.xlu1 %v790_v27, %s2468_s23 }
 0x3dc   : > { %821 = vrot.lane.b32.xlu1 %v793_v29, %s2469_s2 }
 0x3e0   : > { %836 = vrot.lane.b32.xlu1 %v793_v29, %s2470_s17 }
 0x3e4   : > { %846 = vrot.lane.b32.xlu1 %v790_v27, %s2471_s25 }
 0x436   : > { %v798_v30 = vpop.permute.xlu1 %797 }
 0x437   : > { %800 = vst.msk [vmem:[#allocation3] sm:$0xff] %vm794_vm3, %v798_v30 }
 0x438   : > { %v807_v31 = vpop.permute.xlu0 %806 }
 0x439   : > { %810 = vst.msk [vmem:[#allocation2 + $0x8] sm:$0xff] %vm794_vm3, %v807_v31 }
 0x43a   : > { %v802_v32 = vpop.permute.xlu1 %801 }
 0x43b   : > { %804 = vst.msk [vmem:[#allocation4] sm:$0xff] %vm794_vm3, %v802_v32 }
 0x43c   : > { %v842_v33 = vpop.permute.xlu0 %841 }
 0x43d   : > { %845 = vst.msk [vmem:[#allocation3 + $0x18] sm:$0xff] %vm794_vm3, %v842_v33 }
 0x43e   : > { %v812_v34 = vpop.permute.xlu1 %811 }
 0x43f   : > { %815 = vst.msk [vmem:[#allocation3 + $0x8] sm:$0xff] %vm794_vm3, %v812_v34 }
 0x442   : > { %v817_v35 = vpop.permute.xlu1 %816 }
 0x443   : > { %820 = vst.msk [vmem:[#allocation4 + $0x8] sm:$0xff] %vm794_vm3, %v817_v35 }
 0x446   : > { %v827_v36 = vpop.permute.xlu1 %826 }
 0x447   : > { %830 = vst.msk [vmem:[#allocation3 + $0x10] sm:$0xff] %vm794_vm3, %v827_v36 }
 0x44a   : > { %v832_v37 = vpop.permute.xlu1 %831 }
 0x44b   : > { %835 = vst.msk [vmem:[#allocation4 + $0x10] sm:$0xff] %vm794_vm3, %v832_v37 }
 0x44e   : > { %v822_v38 = vpop.permute.xlu1 %821 }
 0x44f   : > { %825 = vst.msk [vmem:[#allocation2 + $0x10] sm:$0xff] %vm794_vm3, %v822_v38 }
 0x452   : > { %v837_v39 = vpop.permute.xlu1 %836 }
 0x453   : > { %840 = vst.msk [vmem:[#allocation2 + $0x18] sm:$0xff] %vm794_vm3, %v837_v39 }
 0x456   : > { %v847_v40 = vpop.permute.xlu1 %846 }
 0x457   : > { %850 = vst.msk [vmem:[#allocation4 + $0x18] sm:$0xff] %vm794_vm3, %v847_v40 }
 0x458 LB: >> { %v2472_v42 = vmov 0.0   ;;  %vm2473_vm4 = vmmov 0   ;;  %s3061_s19 = sshll.u32 %s2440_s0, 3  ;;  %v942_v45 = vlaneseq  ;;  %v2474_v48 = vmov 0   ;;  %s856_s0 = sadd.s32 1, %s2440_s0   ;;  %s2440_s0 = sphi %s3053_s0, %s856_s0   ;;  %v2436_v41 = vphi %v3051_v41, %v3222_v41  }
 0x459   : >> { %1646 = vmatprep.subr.mxu0 %v2472_v42  ;;  %1648 = vmatprep.mubr.msk.f32.mxu0 %vm2473_vm4, %v2472_v42  ;;  %s861_s28 = scalar_lea.vmem [#allocation3], %s3061_s19  ;;  %s859_s27 = scalar_lea.vmem [#allocation2], %s3061_s19  ;;  %v941_v49 = vsel %vm677_vm1, 1, %v2474_v48 }
 0x45a   : >> { %1651 = vmatprep.subr.mxu1 %v2472_v42  ;;  %1653 = vmatprep.mubr.msk.f32.mxu1 %vm2473_vm4, %v2472_v42  ;;  %v862_v43 = vld [vmem:[%s861_s28] sm:$0xff]  ;;  %v943_v46 = vshrl.u32 %v942_v45, 7  ;;  %s863_s1 = scalar_lea.vmem [#allocation4], %s3061_s19  ;;  %s1033_s14 = scalar_lea.vmem [#allocation19], %s3061_s19 }
 0x45b   : >> { %1647 = vmatpush3.xpose.msk.msra.mxu0 %vm794_vm3, %v862_v43  ;;  %v860_v44 = vld [vmem:[%s859_s27] sm:$0xff]  ;;  %p853_p12 = scmp.ge.s32.totalorder %s856_s0, 4  }
 0x45c   : >> { %v944_v47 = vsub.s32 0, %v943_v46  ;;  %v1034_v2 = vld [vmem:[%s1033_s14] sm:$0xff]  ;;  %v1599_v9 = vld [vmem:[#allocation20] ss:$0 sm:$0xff] (%p853_p12)  ;;  %1697 = vmatprep.subr.bf16.mxu0 (%p853_p12), %v2458_v11  ;;  %v1149_v21 = vld [vmem:[#allocation22 + $0x10] sm:$0xff] (%p853_p12)  ;;  %s3223_s24 = sld [smem:[#allocation39_spill]] (%p853_p12) }
 0x45d   : > { %v1147_v19 = vld [vmem:[#allocation22] sm:$0xff] (%p853_p12)  ;;  %v1148_v20 = vld [vmem:[#allocation22 + $0x8] sm:$0xff] (%p853_p12)  ;;  %v1150_v23 = vld [vmem:[#allocation22 + $0x18] sm:$0xff] (%p853_p12)  ;;  %vm1247_vm6 = vcmask (%p853_p12), 523264   ;;  %s1337_s6 = sshll.u32 (%p853_p12), %s3049_s21, 4  ;;  %s3224_s17 = sld [smem:[#allocation48_spill]] (%p853_p12)  ;;  %s3105_s6 = int_to_ptr.vmem [resolvable:$true] %s1337_s6 }
 0x45e   : >> { %1649 = vmatmul.mubr.msk.f32.vlgmr.msra.gmra.mrb[0].mxu0 %vm794_vm3, %v860_v44  ;;  %v945_v50 = vrot.slane %v941_v49, %v944_v47  ;;  %v864_v60 = vld [vmem:[%s863_s1] sm:$0xff]  ;;  %v1698_v22 = vpack.c.bf16 (%p853_p12), %v1148_v20, %v1147_v19  ;;  %v1701_v24 = vpack.c.bf16 (%p853_p12), %v1150_v23, %v1149_v21  ;;  %v1234_v25 = vld [vmem:[#allocation25 + $0x10] sm:$0xff] (%p853_p12)  ;;  %v1235_v27 = vld [vmem:[#allocation25 + $0x18] sm:$0xff] (%p853_p12)  ;;  %s1324_s0 = scalar_lea.sflag (%p853_p12), [#allocation7], %s2977_s4  ;;  %s2326_s19 = scalar_lea.vmem (%p853_p12), %s3105_s6, 128 }
 0x45f   : >> { %1652 = vmatpush3.msra.mxu1 %v864_v60  ;;  %1669 = vmatprep.mubr.msk.f32.mxu0 (%p853_p12), %vm2459_vm2, %v2460_v14  ;;  %v1707_v28 = vpack.c.bf16 (%p853_p12), %v1235_v27, %v1234_v25  ;;  %v1236_v29 = vld [vmem:[#allocation25 + $0x20] sm:$0xff] (%p853_p12)  ;;  %v1237_v30 = vld [vmem:[#allocation25 + $0x28] sm:$0xff] (%p853_p12)  ;;  %v1600_v36 = vld [vmem:[#allocation13] ss:$0 sm:$0xff] (%p853_p12)  ;;  %p2327_p8 = scmp.ne.s32.totalorder (%p853_p12), %s3105_s6, %s2326_s19  ;;  %p3225_p9 = scmp.ne.s32.totalorder (%p853_p12), %s3198_s22, 0 }
 0x460   : >> { %vm946_vm5 = vcmp.eq.s32.totalorder %v945_v50, 1  ;;  %1656 = vmatprep.subr.mxu1 %v2472_v42  ;;  %1699 = vmatpush3.bf16.msra.mxu0 (%p853_p12), %v1698_v22  ;;  %v1710_v31 = vpack.c.bf16 (%p853_p12), %v1237_v30, %v1236_v29  ;;  %v1601_v38 = vld [vmem:[#allocation14] ss:$0 sm:$0xff] (%p853_p12)  ;;  %v1602_v44 = vld [vmem:[#allocation23] ss:$0 sm:$0xff] (%p853_p12)  ;;  %s2475_s28 = smov (%p853_p12), [#allocation28]  }
 0x461   : > { %1700 = vmatprep.subr.bf16.mxu0 (%p853_p12), %v2458_v11  ;;  %v1604_v48 = vld [vmem:[#allocation26] ss:$0 sm:$0xff] (%p853_p12)  ;;  %p2328_p4 = pnand (%p853_p12), %p2327_p8, %p3225_p9  ;;  %s2330_s27 = sshll.u32 (%p853_p12), %s2475_s28, 4  ;;  %s2331_s27 = int_to_ptr.vmem [resolvable:$false] %s2330_s27 }
 0x462   : > { %s1607_s3 = sshll.u32 (%p853_p12), %s3223_s24, 7  ;;  %s2332_s1 = scalar_lea.vmem (%p853_p12), %s2331_s27, 256 }
 0x463   : > { %s3103_s25 = scalar_lea.hbm (%p853_p12), %s3224_s17, %s1607_s3  ;;  %p2329_p13 = pneg (%p853_p12), %p2328_p4 }
 0x464   : > { %1702 = vmatpush3.bf16.msra.mxu0 (%p853_p12), %v1701_v24  ;;  %p2333_p1 = scmp.lt.s32.totalorder (%p853_p12), %s3105_s6, %s2331_s27  ;;  %p2334_p3 = scmp.lt.s32.totalorder (%p853_p12), %s2332_s1, %s2326_s19 }
 0x466   : > { %p2335_p2 = por (%p853_p12), %p2334_p3, %p2333_p1 }
 0x468   : > { %p2336_p10 = pnand (%p853_p12), %p2335_p2, %p2329_p13 }
 0x531   : >> { %v937_v51 = vpop.f32.mrb[0].mxu0 }
 0x532   : >> { %v947_v52 = vsel %vm946_vm5, %v937_v51, -3.4028235e+38  ;;  %v1650_v53 = vpop.f32.mrb[1].mxu0 }
 0x533   : >> { %v948_v54 = vsel %vm794_vm3, %v947_v52, -inf }
 0x534   : >> { %949 = vmax.xlane.f32.xlu0 %v948_v54 }
 0x5c1   : >> { %v950_v55 = vpop.xlane.xlu0 %949 }
 0x5c2   : >> { %v951_v56 = vsub.f32 %v947_v52, %v950_v55 }
 0x5c4   : >> { %v952_v57 = vmul.f32 1.442695, %v951_v56 }
 0x5c6   : >> { %1924 = vpow2.f32 %v952_v57 }
 0x5d0   : >> { %v1925_v58 = vpop.eup %1924 }
 0x5d1   : >> { %v954_v59 = vsel %vm794_vm3, %v1925_v58, 0.0 }
 0x5d2   : >> { %955 = vadd.xlane.f32.xlu0 %v954_v59 }
 0x65f   : >> { %v956_v61 = vpop.xlane.xlu0 %955 }
 0x660   : >> { %1926 = vrcp.f32 %v956_v61 }
 0x66a   : >> { %v1927_v62 = vpop.eup %1926 }
 0x66b   : >> { %v958_v63 = vmul.f32 %v1927_v62, %v1925_v58 }
 0x66d   : >> { %v959_v3 = vsel %vm946_vm5, %v958_v63, 0.0 }
 0x66e   : >> { %1654 = vmatmul.mubr.msk.f32.vlgmr.msra.gmra.mrb[0].mxu1 %vm794_vm3, %v959_v3 }
 0x66f   : >> { %1657 = vmatpush3.msra.mxu1 %v1034_v2  ;;  %1658 = vmatprep.mubr.msk.f32.mxu1 %vm2473_vm4, %v2472_v42  ;;  %v1239_v42 = vld [vmem:[#allocation25 + $0x38] sm:$0xff] (%p853_p12) }
 0x670   : > { %1703 = vmatprep.subr.bf16.mxu1 (%p853_p12), %v2458_v11 }
 0x741   : >> { %v1029_v4 = vpop.f32.mrb[0].mxu1 }
 0x742   : >> { %v1655_v5 = vpop.f32.mrb[1].mxu1  ;;  %1659 = vmatmul.mubr.msk.f32.vlgmr.msra.gmra.mrb[2].mxu1 %vm794_vm3, %v1029_v4 }
 0x743   : > { %1688 = vmatprep.mubr.msk.f32.mxu1 (%p853_p12), %vm2459_vm2, %v2460_v14  ;;  %v1233_v14 = vld [vmem:[#allocation25 + $0x8] sm:$0xff] (%p853_p12) }
 0x812   : > { %855 = sbr.rel (!%p853_p12) target bundleno = 1112 (0x458), region = 202 }
 0x815   : >> { %v1104_v6 = vpop.f32.mrb[2].mxu1 }
 0x816   : >> { %v1108_v7 = vadd.f32 %v2436_v41, %v1104_v6   ;;  %v1660_v8 = vpop.f32.mrb[3].mxu1 }
 0x818   : >> { %v3222_v41 = vmov %v1108_v7  ;;  %v1116_v10 = vadd.f32 (%p853_p12), %v1599_v9, %v1108_v7 }
 0x819   : > { %v1238_v41 = vld [vmem:[#allocation25 + $0x30] sm:$0xff] }
 0x81a   : > { %v1117_v12 = vadd.f32 %v1116_v10, %v3023_v1  ;;  %v1232_v1 = vld [vmem:[#allocation25] sm:$0xff]  ;;  %v1713_v43 = vpack.c.bf16 %v1239_v42, %v1238_v41 }
 0x81b   : > { %v1704_v26 = vpack.c.bf16 %v1233_v14, %v1232_v1 }
 0x81c   : > { %v1120_v13 = vsel %vm680_vm0, %v1117_v12, 0.0 }
 0x81d   : > { %1121 = vadd.xlane.f32.xlu0 %v1120_v13  ;;  %1705 = vmatpush3.bf16.msra.mxu1 %v1704_v26 }
 0x81e   : > { %1706 = vmatprep.subr.bf16.mxu1 %v2458_v11 }
 0x821   : > { %1708 = vmatpush3.bf16.msra.mxu1 %v1707_v28 }
 0x822   : > { %1709 = vmatprep.subr.bf16.mxu1 %v2458_v11 }
 0x825   : > { %1711 = vmatpush3.bf16.msra.mxu1 %v1710_v31 }
 0x826   : > { %1712 = vmatprep.subr.bf16.mxu1 %v2458_v11 }
 0x829   : > { %1714 = vmatpush3.bf16.msra.mxu1 %v1713_v43 }
 0x8aa   : > { %v1122_v15 = vpop.xlane.xlu0 %1121 }
 0x8ab   : > { %v1123_v16 = vmul.f32 0.03125, %v1122_v15 }
 0x8ad   : > { %v1124_v17 = vsub.f32 %v1117_v12, %v1123_v16 }
 0x8af   : > { %v1125_v0 = vmul.f32 %v1124_v17, %v1124_v17 }
 0x8b1   : > { %v1126_v18 = vsel %vm680_vm0, %v1125_v0, 0.0 }
 0x8b2   : > { %1127 = vadd.xlane.f32.xlu0 %v1126_v18 }
 0x93f   : > { %v1128_v32 = vpop.xlane.xlu0 %1127 }
 0x940   : > { %v1129_v33 = vmul.f32 0.03125, %v1128_v32 }
 0x942   : > { %v1130_v34 = vadd.f32 1e-12, %v1129_v33 }
 0x944   : > { %1928 = vrsqrt.f32 %v1130_v34 }
 0x94e   : > { %v1929_v35 = vpop.eup %1928 }
 0x94f   : > { %v1132_v37 = vmul.f32 %v1929_v35, %v1124_v17 }
 0x951   : > { %v1139_v39 = vmul.f32 %v1600_v36, %v1132_v37 }
 0x953   : > { %v1146_v40 = vadd.f32 %v1601_v38, %v1139_v39 }
 0x955   : > { %1670 = vmatmul.mubr.msk.f32.vlgmr.msra.gmra.mrb[0].mxu0 %vm680_vm0, %v1146_v40 }
 0xa28   : > { %v1227_v11 = vpop.f32.mrb[0].mxu0 }
 0xa29   : > { %v1228_v45 = vadd.f32 %v1602_v44, %v1227_v11  ;;  %v1671_v46 = vpop.f32.mrb[1].mxu0 }
 0xa2b   : > { %v1231_v47 = vmax.f32 %v1228_v45, 0.0 }
 0xa2d   : > { %1689 = vmatmul.mubr.msk.f32.vlgmr.msra.gmra.mrb[0].mxu1 %vm1247_vm6, %v1231_v47 }
 0xb00   : > { %v1317_v49 = vpop.f32.mrb[0].mxu1 }
 0xb01   : > { %v1318_v50 = vadd.f32 %v1604_v48, %v1317_v49  ;;  %v1690_v51 = vpop.f32.mrb[1].mxu1 }
 0xb03   : > { %v1321_v52 = vadd.f32 %v1318_v50, %v1117_v12 }
 0xb05   : > { %1322 = vst.msk [vmem:[%s3049_s21] sm:$0xff] %vm680_vm0, %v1321_v52 }
 0xb06   : > { %2339 = shalt.err (!%p2336_p10)
}
 0xb07   : > { %s2340_s4 = scalar_lea.hbm %s3103_s25, 128  ;;  %s2344_s24 = scalar_lea.hbm %s3224_s17, 256 }
 0xb08   : > { %p2341_p11 = scmp.ne.s32.totalorder %s3103_s25, %s2340_s4  ;;  %p2345_p0 = scmp.lt.u32.totalorder %s3103_s25, %s3224_s17 }
 0xb09   : > { %p2346_p6 = scmp.lt.u32.totalorder %s2344_s24, %s2340_s4  ;;  %p2348_p8 = scmp.lt.u32.totalorder %s2340_s4, %s3103_s25 }
 0xb0a   : > { %p2342_p5 = pnand %p2341_p11, %p3225_p9 }
 0xb0b   : > { %p2347_p12 = por %p2346_p6, %p2345_p0 }
 0xb0c   : > { %p2343_p7 = pneg %p2342_p5 }
 0xb0d   : > { %p2349_p4 = por %p2348_p8, %p2347_p12 }
 0xb0f   : > { %p2350_p13 = pnand %p2349_p4, %p2343_p7 }
 0xb11   : > { %2353 = shalt.err (!%p2350_p13)
}
 0xb12   : > { %1767 = dma.vmem_to_hbm [thread:$0]  (%p3225_p9), %s3105_s6, 128, %s3103_s25, %s1324_s0  }
 0xb13 PF: > { %s1349_s2 = sand.u32 1, %s2420_s29   ;;  %p3226_p1 = scmp.ne.s32.totalorder %s3199_s26, 0 }
 0xb14   : > { %p3227_p3 = scmp.ge.s32.totalorder %s2432_s16, 2  ;;  %s1350_s19 = scalar_lea.sflag [#allocation7], %s1349_s2 }
 0xb16   : > { %p1814_p2 = pnand %p3227_p3, %p3226_p1 }
 0xb18   : > { %2415 = dma.done.wait (!%p1814_p2), %s1350_s19, 128  }
 0xb19   : > { %2417 = vsyncadd (!%p1814_p2), %s1350_s19, 4294967168  ;;  %p36_p10 = scmp.ge.s32.totalorder %s2868_s18, 4   ;;  %s3228_s29 = smov %s2424_s30 }
 0xb1a   : > { %s3229_s30 = smov %s2428_s15  ;;  %s3230_s15 = smov %s2879_s20 }
 0xb1b   : > { %s3231_s16 = smov %s2868_s18  ;;  %38 = sbr.rel (!%p36_p10) target bundleno = 22 (0x16), region = 213 }
 0xb22   :  { %1355 = vsyncpa [#allocation6], 1 }
 0xb23   :  { %1357 = vsyncpa [#allocation6 + $0x1], 1 }
 0xb24   :  { %1358 = vsyncpa [#allocation9], 1 }
 0xb25   :  { %1360 = vsyncpa [#allocation9 + $0x1], 1 }
 0xb26   :  { %1361 = vsyncpa [#allocation12], 1 }
 0xb27   :  { %1362 = vsyncpa [#allocation15], 1 }
 0xb28   :  { %1363 = vsyncpa [#allocation18], 1 }
 0xb29   :  { %1364 = vsyncpa [#allocation21], 1 }
 0xb2a   :  { %1365 = vsyncpa [#allocation24], 1 }
 0xb2b   :  { %1366 = vsyncpa [#allocation27], 1 }
 0xb2c   :  { %1367 = vsyncpa [#allocation7], 1 }
 0xb2d   :  { %1369 = vsyncpa [#allocation7 + $0x1], 1 }

</bundles_post_ra>
